<compile_context>
chip_gen: v6e
topology: v6e:2x2x1
jax: 0.10.0
libtpu: 0.0.40
codegen_flags: <defaults>
</compile_context>

<pallas_src>
from functools import partial

import jax
import jax.numpy as jnp
import numpy as np
from jax import lax
from jax.experimental import pallas as pl
from jax.experimental.pallas import tpu as pltpu

BN_EPS = 1e-5


def _round_up(x, m):
    return ((x + m - 1) // m) * m


def _padded_vmem_bytes(shape, dtype):
    """Bytes a VMEM buffer of `shape` really occupies (lane/sublane padding)."""
    itemsize = jnp.dtype(dtype).itemsize
    sublane = 8 * (4 // itemsize) if itemsize < 4 else 8
    dims = list(shape)
    if len(dims) == 1:
        dims = [1] + dims
    dims[-1] = _round_up(dims[-1], 128)
    dims[-2] = _round_up(dims[-2], sublane)
    n = 1
    for d in dims:
        n *= int(d)
    return n * itemsize


# --------------------------------------------------------------------------
# Kernel: one batch tile [TB, D] -> lane-dense logits [1, 1, TB]
# --------------------------------------------------------------------------
def dcn_kernel(x_ref, cw_ref, cb_ref,
               w1_ref, b1_ref, w2_ref, b2_ref,
               wpc_ref, wpd_ref, bp_ref,
               out_ref, *, cross_layer_num):
    x0 = x_ref[...]                                          # [TB, D] f32
    tb = x0.shape[0]

    # ---------------- cross network (f32, VPU/XLU) -------------------------
    cw = cw_ref[...]                                         # [L, D]
    cb = cb_ref[...]                                         # [L, D]
    x_l = x0
    for i in range(cross_layer_num):                         # static, unrolled
        w_i = cw[i:i + 1, :]                                 # [1, D]
        b_i = cb[i:i + 1, :]                                 # [1, D]
        xl_w = jnp.sum(x_l * w_i, axis=-1, keepdims=True)    # [TB, 1]
        x_l = x0 * xl_w + b_i + x_l                          # [TB, D]

    # ---------------- deep network (Dropout=id, Linear+BN folded, ReLU) ----
    # bf16 MXU operands (3x fewer MXU passes than f32xf32), f32 accumulate.
    mxu_dtype = w1_ref.dtype
    h = jnp.dot(x0.astype(mxu_dtype), w1_ref[...],
                preferred_element_type=jnp.float32) + b1_ref[...]
    h = jnp.maximum(h, 0.0)
    h = jnp.dot(h.astype(mxu_dtype), w2_ref[...],
                preferred_element_type=jnp.float32) + b2_ref[...]
    h = jnp.maximum(h, 0.0)                                  # [TB, h2] f32

    # ---------------- predict layer, lane-dense row output -----------------
    # logit[b] = wp_cross . x_l[b] + wp_deep . h[b] + bp, computed as
    # W @ act.T (contract last dims, "q @ k.T" form) so the result is a
    # [8, TB] row slab with batch on the lane axis -> unmasked lane-dense
    # stores instead of TB/8 single-lane vst.msk.  Rows 1..7 of wpc/wpd are
    # zero; row 0 carries the real predict weights.
    nt = (((1,), (1,)), ((), ()))                            # A @ B.T
    logit8 = (lax.dot_general(wpc_ref[...], x_l, nt,
                              preferred_element_type=jnp.float32)
              + lax.dot_general(wpd_ref[...], h, nt,
                                preferred_element_type=jnp.float32))  # [8, TB]
    logit = logit8[0:1, :] + bp_ref[...]                     # [1, TB]
    out_ref[...] = logit.reshape(1, 1, tb)                   # [1, 1, TB]


# --------------------------------------------------------------------------
# Host-side parameter prep: fold eval-mode BN + bias into the Linear weights,
# cast MLP weights to bf16, pad predict weights to 8-row slabs.
# --------------------------------------------------------------------------
def _fold_bn(w, b, gamma, beta, rm, rv, eps=BN_EPS):
    scale = gamma * lax.rsqrt(rv + eps)                      # [1, out]
    return w * scale, (b - rm) * scale + beta


def fold_params(params, mlp_dtype=jnp.bfloat16):
    w1f, b1f = _fold_bn(params["w1"], params["b1"], params["g1"],
                        params["beta1"], params["rm1"], params["rv1"])
    w2f, b2f = _fold_bn(params["w2"], params["b2"], params["g2"],
                        params["beta2"], params["rm2"], params["rv2"])
    D = params["w1"].shape[0]
    h2 = params["w2"].shape[1]
    wpc = jnp.zeros((8, D), jnp.float32).at[0, :].set(params["wp_cross"][:, 0])
    wpd = jnp.zeros((8, h2), jnp.float32).at[0, :].set(params["wp_deep"][:, 0])
    return {
        "cross_w": params["cross_w"],                        # [L, D]  f32
        "cross_b": params["cross_b"],                        # [L, D]  f32
        "w1": w1f.astype(mlp_dtype), "b1": b1f,              # [D, h1] bf16, [1, h1] f32
        "w2": w2f.astype(mlp_dtype), "b2": b2f,              # [h1,h2] bf16, [1, h2] f32
        "wp_cross": wpc, "wp_deep": wpd,                     # [8, D], [8, h2] f32
        "bp": params["bp"],                                  # [1, 1]  f32
    }


# --------------------------------------------------------------------------
# Wrapper: batch-tiled pallas_call
# --------------------------------------------------------------------------
def dcn_forward(x, params, *, cross_layer_num, block_batch=2048,
                mlp_dtype=jnp.bfloat16):
    """x: [B, D] float32.  Returns logits [B] (== forward().squeeze(1))."""
    B, D = x.shape
    fp = fold_params(params, mlp_dtype)
    L = fp["cross_w"].shape[0]
    h1 = fp["w1"].shape[1]
    h2 = fp["w2"].shape[1]

    # Batch tile: as big as practical (per-grid-step overhead ~0.35us), but
    # keep >= 2 grid steps so v7x's two TensorCores both get work, and keep
    # it sublane (8) aligned.  Sweep block_batch in 2048..8192 per chip.
    TB = _round_up(max(int(block_batch), 8), 8)
    TB = min(TB, _round_up((B + 1) // 2, 8))
    TB = max(TB, 8)
    Bp = _round_up(B, TB)
    if Bp != B:
        x = jnp.pad(x, ((0, Bp - B), (0, 0)))
    grid_b = Bp // TB

    args = (x,
            fp["cross_w"], fp["cross_b"],
            fp["w1"], fp["b1"], fp["w2"], fp["b2"],
            fp["wp_cross"], fp["wp_deep"], fp["bp"])

    # ---- padding-aware VMEM budget (lanes->128, sublanes->8/16) ----
    xt = 2 * _padded_vmem_bytes((TB, D), jnp.float32)          # x double buffer
    ot = 2 * _padded_vmem_bytes((1, TB), jnp.float32)          # out double buffer
    wt = sum(_padded_vmem_bytes(a.shape, a.dtype) for a in args[1:])
    interm = 12 * _padded_vmem_bytes((TB, max(D, h1, h2)), jnp.float32)
    vmem_budget = int(xt + ot + 2 * wt + interm + (2 << 20))
    vmem_budget = min(vmem_budget, 120 << 20)

    cost = pl.CostEstimate(
        flops=int(Bp * (2 * D * h1 + 2 * h1 * h2
                        + 5 * D * cross_layer_num + 2 * (D + h2))),
        transcendentals=0,
        bytes_accessed=int(4 * (Bp * D + Bp)
                           + sum(a.size * a.dtype.itemsize for a in args[1:])),
    )

    out_shape = jax.ShapeDtypeStruct((grid_b, 1, TB), jnp.float32)

    def build(single_buffer_weights):
        def const_spec(a):
            if single_buffer_weights:
                # Constant-index weights: stay VMEM-resident, no double buffer.
                return pl.BlockSpec(a.shape, lambda i: (0,) * a.ndim,
                                    pipeline_mode=pl.Buffered(1))
            return pl.BlockSpec(a.shape, lambda i: (0,) * a.ndim)

        in_specs = ([pl.BlockSpec((TB, D), lambda i: (i, 0))]
                    + [const_spec(a) for a in args[1:]])
        out_specs = pl.BlockSpec((1, 1, TB), lambda i: (i, 0, 0))
        return pl.pallas_call(
            partial(dcn_kernel, cross_layer_num=cross_layer_num),
            out_shape=out_shape,
            grid=(grid_b,),
            in_specs=in_specs,
            out_specs=out_specs,
            compiler_params=pltpu.CompilerParams(
                dimension_semantics=("parallel",),   # shard batch tiles across TCs
                vmem_limit_bytes=vmem_budget,
            ),
            cost_estimate=cost,
        )

    try:
        out = build(True)(*args)
    except Exception:
        # Fallback if single-buffering (pl.Buffered(1)) is unsupported in this
        # JAX version; weights are tiny so double buffering them is harmless.
        out = build(False)(*args)

    return out.reshape(Bp)[:B]


# --------------------------------------------------------------------------
# Parameter construction (matches the torch module's init scheme)
# --------------------------------------------------------------------------
def xavier_normal(key, fan_in, fan_out):
    std = (2.0 / (fan_in + fan_out)) ** 0.5
    return std * jax.random.normal(key, (fan_in, fan_out), dtype=jnp.float32)


def make_params(key, total_dim, mlp_hidden, cross_layer_num):
    h1, h2 = mlp_hidden
    ks = jax.random.split(key, 6)
    params = {
        # cross network: w ~ N(0,1) (torch.randn), b = zeros
        "cross_w": jax.random.normal(ks[0], (cross_layer_num, total_dim), dtype=jnp.float32),
        "cross_b": jnp.zeros((cross_layer_num, total_dim), dtype=jnp.float32),
        # MLP layer 1: Linear(total_dim -> h1), xavier_normal weight, zero bias
        "w1": xavier_normal(ks[1], total_dim, h1),
        "b1": jnp.zeros((1, h1), dtype=jnp.float32),
        # BatchNorm1d(h1) defaults (eval mode, running stats)
        "g1": jnp.ones((1, h1), dtype=jnp.float32),
        "beta1": jnp.zeros((1, h1), dtype=jnp.float32),
        "rm1": jnp.zeros((1, h1), dtype=jnp.float32),
        "rv1": jnp.ones((1, h1), dtype=jnp.float32),
        # MLP layer 2: Linear(h1 -> h2)
        "w2": xavier_normal(ks[2], h1, h2),
        "b2": jnp.zeros((1, h2), dtype=jnp.float32),
        "g2": jnp.ones((1, h2), dtype=jnp.float32),
        "beta2": jnp.zeros((1, h2), dtype=jnp.float32),
        "rm2": jnp.zeros((1, h2), dtype=jnp.float32),
        "rv2": jnp.ones((1, h2), dtype=jnp.float32),
        # predict Linear(total_dim + h2 -> 1), split into cross/deep halves
        "bp": jnp.zeros((1, 1), dtype=jnp.float32),
    }
    wp = xavier_normal(ks[3], total_dim + h2, 1)             # [D + h2, 1]
    params["wp_cross"] = wp[:total_dim, :]                   # [D, 1]
    params["wp_deep"] = wp[total_dim:, :]                    # [h2, 1]
    return params


# --------------------------------------------------------------------------
# Pure-JAX f32 reference (mirrors the torch forward) for a correctness check
# --------------------------------------------------------------------------
def dcn_reference(x, params, cross_layer_num):
    x0 = x
    x_l = x0
    for i in range(cross_layer_num):
        w_i = params["cross_w"][i]
        b_i = params["cross_b"][i]
        xl_w = x_l @ w_i                                     # [B]
        x_l = x0 * xl_w[:, None] + b_i + x_l
    s1 = params["g1"] * lax.rsqrt(params["rv1"] + BN_EPS)
    h = x0 @ params["w1"] + params["b1"]
    h = (h - params["rm1"]) * s1 + params["beta1"]
    h = jnp.maximum(h, 0.0)
    s2 = params["g2"] * lax.rsqrt(params["rv2"] + BN_EPS)
    h = h @ params["w2"] + params["b2"]
    h = (h - params["rm2"]) * s2 + params["beta2"]
    h = jnp.maximum(h, 0.0)
    logit = (x_l @ params["wp_cross"] + h @ params["wp_deep"] + params["bp"])
    return logit[:, 0]


if __name__ == "__main__":
    # Small, DCN-consistent config; batch chosen to exercise padding and a
    # multi-step ("parallel") grid.
    batch = 100
    user_feat_size = 16
    item_feat_size = 8
    total_dim = user_feat_size + 2 * item_feat_size          # 32
    mlp_hidden_size = [64, 32]
    cross_layer_num = 3

    key = jax.random.PRNGKey(0)
    k_x, k_p = jax.random.split(key)

    # dcn_all_embeddings (concatenated field embeddings): [B, total_dim]
    x = jax.random.normal(k_x, (batch, total_dim), dtype=jnp.float32)
    params = make_params(k_p, total_dim, mlp_hidden_size, cross_layer_num)

    logits = dcn_forward(x, params, cross_layer_num=cross_layer_num)
    jax.block_until_ready(logits)
    assert logits.shape == (batch,)

    # Reference is pure f32; kernel runs the deep MLP with bf16 MXU operands,
    # and the randn cross weights make logits O(100), so use a bf16-appropriate
    # tolerance (still far below any structural-bug-sized error).
    ref = dcn_reference(x, params, cross_layer_num)
    np.testing.assert_allclose(np.asarray(logits), np.asarray(ref),
                               rtol=2e-2, atol=2e-1)
    print("KERNEL_OK")
</pallas_src>

<mosaic_0001>
module attributes {stable_mosaic.version = 11 : i64} {
  func.func @dcn_kernel(%arg0: i32, %arg1: memref<56x32xf32, #tpu.memory_space<vmem>>, %arg2: memref<3x32xf32, #tpu.memory_space<vmem>>, %arg3: memref<3x32xf32, #tpu.memory_space<vmem>>, %arg4: memref<32x64xbf16, #tpu.memory_space<vmem>>, %arg5: memref<1x64xf32, #tpu.memory_space<vmem>>, %arg6: memref<64x32xbf16, #tpu.memory_space<vmem>>, %arg7: memref<1x32xf32, #tpu.memory_space<vmem>>, %arg8: memref<8x32xf32, #tpu.memory_space<vmem>>, %arg9: memref<8x32xf32, #tpu.memory_space<vmem>>, %arg10: memref<1x1xf32, #tpu.memory_space<vmem>>, %arg11: memref<1x1x56xf32, #tpu.memory_space<vmem>>) attributes {dimension_semantics = [#tpu.dimension_semantics<parallel>], iteration_bounds = array<i64: 2>, scalar_prefetch = 0 : i64, scratch_operands = 0 : i64, tpu.core_type = #tpu.core_type<tc>, window_params = [{transform_indices = @transform_0, window_bounds = array<i64: 56, 32>}, {pipeline_mode = #tpu.pipeline_mode<synchronous>, transform_indices = @transform_1, window_bounds = array<i64: 3, 32>}, {pipeline_mode = #tpu.pipeline_mode<synchronous>, transform_indices = @transform_2, window_bounds = array<i64: 3, 32>}, {pipeline_mode = #tpu.pipeline_mode<synchronous>, transform_indices = @transform_3, window_bounds = array<i64: 32, 64>}, {pipeline_mode = #tpu.pipeline_mode<synchronous>, transform_indices = @transform_4, window_bounds = array<i64: 1, 64>}, {pipeline_mode = #tpu.pipeline_mode<synchronous>, transform_indices = @transform_5, window_bounds = array<i64: 64, 32>}, {pipeline_mode = #tpu.pipeline_mode<synchronous>, transform_indices = @transform_6, window_bounds = array<i64: 1, 32>}, {pipeline_mode = #tpu.pipeline_mode<synchronous>, transform_indices = @transform_7, window_bounds = array<i64: 8, 32>}, {pipeline_mode = #tpu.pipeline_mode<synchronous>, transform_indices = @transform_8, window_bounds = array<i64: 8, 32>}, {pipeline_mode = #tpu.pipeline_mode<synchronous>, transform_indices = @transform_9, window_bounds = array<i64: 1, 1>}, {transform_indices = @transform_10, window_bounds = array<i64: 1, 1, 56>}]} {
    %c0 = arith.constant 0 : index
    %c0_0 = arith.constant 0 : index
    %0 = vector.load %arg1[%c0, %c0_0] : memref<56x32xf32, #tpu.memory_space<vmem>>, vector<56x32xf32>
    %c0_1 = arith.constant 0 : index
    %c0_2 = arith.constant 0 : index
    %1 = vector.load %arg2[%c0_1, %c0_2] : memref<3x32xf32, #tpu.memory_space<vmem>>, vector<3x32xf32>
    %c0_3 = arith.constant 0 : index
    %c0_4 = arith.constant 0 : index
    %2 = vector.load %arg3[%c0_3, %c0_4] : memref<3x32xf32, #tpu.memory_space<vmem>>, vector<3x32xf32>
    %3 = vector.extract_strided_slice %1 {offsets = [0, 0], sizes = [1, 32], strides = [1, 1]} : vector<3x32xf32> to vector<1x32xf32>
    %4 = vector.extract_strided_slice %2 {offsets = [0, 0], sizes = [1, 32], strides = [1, 1]} : vector<3x32xf32> to vector<1x32xf32>
    %5 = vector.broadcast %3 : vector<1x32xf32> to vector<56x32xf32>
    %6 = arith.mulf %0, %5 : vector<56x32xf32>
    %cst = arith.constant dense<0.000000e+00> : vector<56xf32>
    %7 = vector.multi_reduction <add>, %6, %cst [1] : vector<56x32xf32> to vector<56xf32>
    %8 = vector.shape_cast %7 : vector<56xf32> to vector<56x1xf32>
    %9 = vector.broadcast %8 : vector<56x1xf32> to vector<56x32xf32>
    %10 = arith.mulf %0, %9 : vector<56x32xf32>
    %11 = vector.broadcast %4 : vector<1x32xf32> to vector<56x32xf32>
    %12 = arith.addf %10, %11 : vector<56x32xf32>
    %13 = arith.addf %12, %0 : vector<56x32xf32>
    %14 = vector.extract_strided_slice %1 {offsets = [1, 0], sizes = [1, 32], strides = [1, 1]} : vector<3x32xf32> to vector<1x32xf32>
    %15 = vector.extract_strided_slice %2 {offsets = [1, 0], sizes = [1, 32], strides = [1, 1]} : vector<3x32xf32> to vector<1x32xf32>
    %16 = vector.broadcast %14 : vector<1x32xf32> to vector<56x32xf32>
    %17 = arith.mulf %13, %16 : vector<56x32xf32>
    %cst_5 = arith.constant dense<0.000000e+00> : vector<56xf32>
    %18 = vector.multi_reduction <add>, %17, %cst_5 [1] : vector<56x32xf32> to vector<56xf32>
    %19 = vector.shape_cast %18 : vector<56xf32> to vector<56x1xf32>
    %20 = vector.broadcast %19 : vector<56x1xf32> to vector<56x32xf32>
    %21 = arith.mulf %0, %20 : vector<56x32xf32>
    %22 = vector.broadcast %15 : vector<1x32xf32> to vector<56x32xf32>
    %23 = arith.addf %21, %22 : vector<56x32xf32>
    %24 = arith.addf %23, %13 : vector<56x32xf32>
    %25 = vector.extract_strided_slice %1 {offsets = [2, 0], sizes = [1, 32], strides = [1, 1]} : vector<3x32xf32> to vector<1x32xf32>
    %26 = vector.extract_strided_slice %2 {offsets = [2, 0], sizes = [1, 32], strides = [1, 1]} : vector<3x32xf32> to vector<1x32xf32>
    %27 = vector.broadcast %25 : vector<1x32xf32> to vector<56x32xf32>
    %28 = arith.mulf %24, %27 : vector<56x32xf32>
    %cst_6 = arith.constant dense<0.000000e+00> : vector<56xf32>
    %29 = vector.multi_reduction <add>, %28, %cst_6 [1] : vector<56x32xf32> to vector<56xf32>
    %30 = vector.shape_cast %29 : vector<56xf32> to vector<56x1xf32>
    %31 = vector.broadcast %30 : vector<56x1xf32> to vector<56x32xf32>
    %32 = arith.mulf %0, %31 : vector<56x32xf32>
    %33 = vector.broadcast %26 : vector<1x32xf32> to vector<56x32xf32>
    %34 = arith.addf %32, %33 : vector<56x32xf32>
    %35 = arith.addf %34, %24 : vector<56x32xf32>
    %36 = arith.truncf %0 : vector<56x32xf32> to vector<56x32xbf16>
    %c0_7 = arith.constant 0 : index
    %c0_8 = arith.constant 0 : index
    %37 = vector.load %arg4[%c0_7, %c0_8] : memref<32x64xbf16, #tpu.memory_space<vmem>>, vector<32x64xbf16>
    %cst_9 = arith.constant dense<0.000000e+00> : vector<56x64xf32>
    %38 = tpu.matmul %36, %37, %cst_9 {dimension_numbers = #tpu.dot_dimension_numbers<[1], [0], [0], [1], [0, 0, 1, 1], [], []>} : vector<56x32xbf16>, vector<32x64xbf16>, vector<56x64xf32> -> vector<56x64xf32>
    %c0_10 = arith.constant 0 : index
    %c0_11 = arith.constant 0 : index
    %39 = vector.load %arg5[%c0_10, %c0_11] : memref<1x64xf32, #tpu.memory_space<vmem>>, vector<1x64xf32>
    %40 = vector.broadcast %39 : vector<1x64xf32> to vector<56x64xf32>
    %41 = arith.addf %38, %40 : vector<56x64xf32>
    %cst_12 = arith.constant 0.000000e+00 : f32
    %42 = vector.broadcast %cst_12 : f32 to vector<56x64xf32>
    %43 = arith.maximumf %41, %42 : vector<56x64xf32>
    %44 = arith.truncf %43 : vector<56x64xf32> to vector<56x64xbf16>
    %c0_13 = arith.constant 0 : index
    %c0_14 = arith.constant 0 : index
    %45 = vector.load %arg6[%c0_13, %c0_14] : memref<64x32xbf16, #tpu.memory_space<vmem>>, vector<64x32xbf16>
    %cst_15 = arith.constant dense<0.000000e+00> : vector<56x32xf32>
    %46 = tpu.matmul %44, %45, %cst_15 {dimension_numbers = #tpu.dot_dimension_numbers<[1], [0], [0], [1], [0, 0, 1, 1], [], []>} : vector<56x64xbf16>, vector<64x32xbf16>, vector<56x32xf32> -> vector<56x32xf32>
    %c0_16 = arith.constant 0 : index
    %c0_17 = arith.constant 0 : index
    %47 = vector.load %arg7[%c0_16, %c0_17] : memref<1x32xf32, #tpu.memory_space<vmem>>, vector<1x32xf32>
    %48 = vector.broadcast %47 : vector<1x32xf32> to vector<56x32xf32>
    %49 = arith.addf %46, %48 : vector<56x32xf32>
    %cst_18 = arith.constant 0.000000e+00 : f32
    %50 = vector.broadcast %cst_18 : f32 to vector<56x32xf32>
    %51 = arith.maximumf %49, %50 : vector<56x32xf32>
    %c0_19 = arith.constant 0 : index
    %c0_20 = arith.constant 0 : index
    %52 = vector.load %arg8[%c0_19, %c0_20] : memref<8x32xf32, #tpu.memory_space<vmem>>, vector<8x32xf32>
    %cst_21 = arith.constant dense<0.000000e+00> : vector<8x56xf32>
    %53 = tpu.matmul %52, %35, %cst_21 {dimension_numbers = #tpu.dot_dimension_numbers<[1], [1], [0], [0], [0, 0, 1, 0], [], []>} : vector<8x32xf32>, vector<56x32xf32>, vector<8x56xf32> -> vector<8x56xf32>
    %c0_22 = arith.constant 0 : index
    %c0_23 = arith.constant 0 : index
    %54 = vector.load %arg9[%c0_22, %c0_23] : memref<8x32xf32, #tpu.memory_space<vmem>>, vector<8x32xf32>
    %cst_24 = arith.constant dense<0.000000e+00> : vector<8x56xf32>
    %55 = tpu.matmul %54, %51, %cst_24 {dimension_numbers = #tpu.dot_dimension_numbers<[1], [1], [0], [0], [0, 0, 1, 0], [], []>} : vector<8x32xf32>, vector<56x32xf32>, vector<8x56xf32> -> vector<8x56xf32>
    %56 = arith.addf %53, %55 : vector<8x56xf32>
    %57 = vector.extract_strided_slice %56 {offsets = [0, 0], sizes = [1, 56], strides = [1, 1]} : vector<8x56xf32> to vector<1x56xf32>
    %c0_25 = arith.constant 0 : index
    %c0_26 = arith.constant 0 : index
    %58 = vector.load %arg10[%c0_25, %c0_26] : memref<1x1xf32, #tpu.memory_space<vmem>>, vector<1x1xf32>
    %59 = vector.broadcast %58 : vector<1x1xf32> to vector<1x56xf32>
    %60 = arith.addf %57, %59 : vector<1x56xf32>
    %61 = vector.shape_cast %60 : vector<1x56xf32> to vector<1x1x56xf32>
    %c0_27 = arith.constant 0 : index
    %c0_28 = arith.constant 0 : index
    %c0_29 = arith.constant 0 : index
    %62 = vector.load %arg11[%c0_27, %c0_28, %c0_29] : memref<1x1x56xf32, #tpu.memory_space<vmem>>, vector<1x1x56xf32>
    tpu.vector_store %arg11[%c0_27, %c0_28, %c0_29], %61 {strides = array<i32>} : memref<1x1x56xf32, #tpu.memory_space<vmem>>, vector<1x1x56xf32>,
    return
  }
  func.func @transform_0(%arg0: i32) -> (i32, i32) {
    %c0_i32 = arith.constant 0 : i32
    %c0_i32_0 = arith.constant 0 : i32
    return %arg0, %c0_i32 : i32, i32
  }
  func.func @transform_1(%arg0: i32) -> (i32, i32) {
    %c0_i32 = arith.constant 0 : i32
    %c0_i32_0 = arith.constant 0 : i32
    %c0_i32_1 = arith.constant 0 : i32
    return %c0_i32, %c0_i32_0 : i32, i32
  }
  func.func @transform_2(%arg0: i32) -> (i32, i32) {
    %c0_i32 = arith.constant 0 : i32
    %c0_i32_0 = arith.constant 0 : i32
    %c0_i32_1 = arith.constant 0 : i32
    return %c0_i32, %c0_i32_0 : i32, i32
  }
  func.func @transform_3(%arg0: i32) -> (i32, i32) {
    %c0_i32 = arith.constant 0 : i32
    %c0_i32_0 = arith.constant 0 : i32
    %c0_i32_1 = arith.constant 0 : i32
    return %c0_i32, %c0_i32_0 : i32, i32
  }
  func.func @transform_4(%arg0: i32) -> (i32, i32) {
    %c0_i32 = arith.constant 0 : i32
    %c0_i32_0 = arith.constant 0 : i32
    %c0_i32_1 = arith.constant 0 : i32
    return %c0_i32, %c0_i32_0 : i32, i32
  }
  func.func @transform_5(%arg0: i32) -> (i32, i32) {
    %c0_i32 = arith.constant 0 : i32
    %c0_i32_0 = arith.constant 0 : i32
    %c0_i32_1 = arith.constant 0 : i32
    return %c0_i32, %c0_i32_0 : i32, i32
  }
  func.func @transform_6(%arg0: i32) -> (i32, i32) {
    %c0_i32 = arith.constant 0 : i32
    %c0_i32_0 = arith.constant 0 : i32
    %c0_i32_1 = arith.constant 0 : i32
    return %c0_i32, %c0_i32_0 : i32, i32
  }
  func.func @transform_7(%arg0: i32) -> (i32, i32) {
    %c0_i32 = arith.constant 0 : i32
    %c0_i32_0 = arith.constant 0 : i32
    %c0_i32_1 = arith.constant 0 : i32
    return %c0_i32, %c0_i32_0 : i32, i32
  }
  func.func @transform_8(%arg0: i32) -> (i32, i32) {
    %c0_i32 = arith.constant 0 : i32
    %c0_i32_0 = arith.constant 0 : i32
    %c0_i32_1 = arith.constant 0 : i32
    return %c0_i32, %c0_i32_0 : i32, i32
  }
  func.func @transform_9(%arg0: i32) -> (i32, i32) {
    %c0_i32 = arith.constant 0 : i32
    %c0_i32_0 = arith.constant 0 : i32
    %c0_i32_1 = arith.constant 0 : i32
    return %c0_i32, %c0_i32_0 : i32, i32
  }
  func.func @transform_10(%arg0: i32) -> (i32, i32, i32) {
    %c0_i32 = arith.constant 0 : i32
    %c0_i32_0 = arith.constant 0 : i32
    %c0_i32_1 = arith.constant 0 : i32
    return %arg0, %c0_i32, %c0_i32_0 : i32, i32, i32
  }
}

module attributes {stable_mosaic.version = 11 : i64} {
  func.func @dcn_kernel(%arg0: i32, %arg1: memref<56x32xf32, #tpu.memory_space<vmem>>, %arg2: memref<3x32xf32, #tpu.memory_space<vmem>>, %arg3: memref<3x32xf32, #tpu.memory_space<vmem>>, %arg4: memref<32x64xbf16, #tpu.memory_space<vmem>>, %arg5: memref<1x64xf32, #tpu.memory_space<vmem>>, %arg6: memref<64x32xbf16, #tpu.memory_space<vmem>>, %arg7: memref<1x32xf32, #tpu.memory_space<vmem>>, %arg8: memref<8x32xf32, #tpu.memory_space<vmem>>, %arg9: memref<8x32xf32, #tpu.memory_space<vmem>>, %arg10: memref<1x1xf32, #tpu.memory_space<vmem>>, %arg11: memref<1x1x56xf32, #tpu.memory_space<vmem>>) attributes {dimension_semantics = [#tpu.dimension_semantics<parallel>], iteration_bounds = array<i64: 2>, scalar_prefetch = 0 : i64, scratch_operands = 0 : i64, tpu.core_type = #tpu.core_type<tc>, window_params = [{transform_indices = @transform_0, window_bounds = array<i64: 56, 32>}, {pipeline_mode = #tpu.pipeline_mode<synchronous>, transform_indices = @transform_1, window_bounds = array<i64: 3, 32>}, {pipeline_mode = #tpu.pipeline_mode<synchronous>, transform_indices = @transform_2, window_bounds = array<i64: 3, 32>}, {pipeline_mode = #tpu.pipeline_mode<synchronous>, transform_indices = @transform_3, window_bounds = array<i64: 32, 64>}, {pipeline_mode = #tpu.pipeline_mode<synchronous>, transform_indices = @transform_4, window_bounds = array<i64: 1, 64>}, {pipeline_mode = #tpu.pipeline_mode<synchronous>, transform_indices = @transform_5, window_bounds = array<i64: 64, 32>}, {pipeline_mode = #tpu.pipeline_mode<synchronous>, transform_indices = @transform_6, window_bounds = array<i64: 1, 32>}, {pipeline_mode = #tpu.pipeline_mode<synchronous>, transform_indices = @transform_7, window_bounds = array<i64: 8, 32>}, {pipeline_mode = #tpu.pipeline_mode<synchronous>, transform_indices = @transform_8, window_bounds = array<i64: 8, 32>}, {pipeline_mode = #tpu.pipeline_mode<synchronous>, transform_indices = @transform_9, window_bounds = array<i64: 1, 1>}, {transform_indices = @transform_10, window_bounds = array<i64: 1, 1, 56>}]} {
    %c0 = arith.constant 0 : index
    %c0_0 = arith.constant 0 : index
    %0 = vector.load %arg1[%c0, %c0_0] : memref<56x32xf32, #tpu.memory_space<vmem>>, vector<56x32xf32>
    %c0_1 = arith.constant 0 : index
    %c0_2 = arith.constant 0 : index
    %1 = vector.load %arg2[%c0_1, %c0_2] : memref<3x32xf32, #tpu.memory_space<vmem>>, vector<3x32xf32>
    %c0_3 = arith.constant 0 : index
    %c0_4 = arith.constant 0 : index
    %2 = vector.load %arg3[%c0_3, %c0_4] : memref<3x32xf32, #tpu.memory_space<vmem>>, vector<3x32xf32>
    %3 = vector.extract_strided_slice %1 {offsets = [0, 0], sizes = [1, 32], strides = [1, 1]} : vector<3x32xf32> to vector<1x32xf32>
    %4 = vector.extract_strided_slice %2 {offsets = [0, 0], sizes = [1, 32], strides = [1, 1]} : vector<3x32xf32> to vector<1x32xf32>
    %5 = vector.broadcast %3 : vector<1x32xf32> to vector<56x32xf32>
    %6 = arith.mulf %0, %5 : vector<56x32xf32>
    %cst = arith.constant dense<0.000000e+00> : vector<56xf32>
    %7 = vector.multi_reduction <add>, %6, %cst [1] : vector<56x32xf32> to vector<56xf32>
    %8 = vector.shape_cast %7 : vector<56xf32> to vector<56x1xf32>
    %9 = vector.broadcast %8 : vector<56x1xf32> to vector<56x32xf32>
    %10 = arith.mulf %0, %9 : vector<56x32xf32>
    %11 = vector.broadcast %4 : vector<1x32xf32> to vector<56x32xf32>
    %12 = arith.addf %10, %11 : vector<56x32xf32>
    %13 = arith.addf %12, %0 : vector<56x32xf32>
    %14 = vector.extract_strided_slice %1 {offsets = [1, 0], sizes = [1, 32], strides = [1, 1]} : vector<3x32xf32> to vector<1x32xf32>
    %15 = vector.extract_strided_slice %2 {offsets = [1, 0], sizes = [1, 32], strides = [1, 1]} : vector<3x32xf32> to vector<1x32xf32>
    %16 = vector.broadcast %14 : vector<1x32xf32> to vector<56x32xf32>
    %17 = arith.mulf %13, %16 : vector<56x32xf32>
    %cst_5 = arith.constant dense<0.000000e+00> : vector<56xf32>
    %18 = vector.multi_reduction <add>, %17, %cst_5 [1] : vector<56x32xf32> to vector<56xf32>
    %19 = vector.shape_cast %18 : vector<56xf32> to vector<56x1xf32>
    %20 = vector.broadcast %19 : vector<56x1xf32> to vector<56x32xf32>
    %21 = arith.mulf %0, %20 : vector<56x32xf32>
    %22 = vector.broadcast %15 : vector<1x32xf32> to vector<56x32xf32>
    %23 = arith.addf %21, %22 : vector<56x32xf32>
    %24 = arith.addf %23, %13 : vector<56x32xf32>
    %25 = vector.extract_strided_slice %1 {offsets = [2, 0], sizes = [1, 32], strides = [1, 1]} : vector<3x32xf32> to vector<1x32xf32>
    %26 = vector.extract_strided_slice %2 {offsets = [2, 0], sizes = [1, 32], strides = [1, 1]} : vector<3x32xf32> to vector<1x32xf32>
    %27 = vector.broadcast %25 : vector<1x32xf32> to vector<56x32xf32>
    %28 = arith.mulf %24, %27 : vector<56x32xf32>
    %cst_6 = arith.constant dense<0.000000e+00> : vector<56xf32>
    %29 = vector.multi_reduction <add>, %28, %cst_6 [1] : vector<56x32xf32> to vector<56xf32>
    %30 = vector.shape_cast %29 : vector<56xf32> to vector<56x1xf32>
    %31 = vector.broadcast %30 : vector<56x1xf32> to vector<56x32xf32>
    %32 = arith.mulf %0, %31 : vector<56x32xf32>
    %33 = vector.broadcast %26 : vector<1x32xf32> to vector<56x32xf32>
    %34 = arith.addf %32, %33 : vector<56x32xf32>
    %35 = arith.addf %34, %24 : vector<56x32xf32>
    %36 = arith.truncf %0 : vector<56x32xf32> to vector<56x32xbf16>
    %c0_7 = arith.constant 0 : index
    %c0_8 = arith.constant 0 : index
    %37 = vector.load %arg4[%c0_7, %c0_8] : memref<32x64xbf16, #tpu.memory_space<vmem>>, vector<32x64xbf16>
    %cst_9 = arith.constant dense<0.000000e+00> : vector<56x64xf32>
    %38 = tpu.matmul %36, %37, %cst_9 {dimension_numbers = #tpu.dot_dimension_numbers<[1], [0], [0], [1], [0, 0, 1, 1], [], []>} : vector<56x32xbf16>, vector<32x64xbf16>, vector<56x64xf32> -> vector<56x64xf32>
    %c0_10 = arith.constant 0 : index
    %c0_11 = arith.constant 0 : index
    %39 = vector.load %arg5[%c0_10, %c0_11] : memref<1x64xf32, #tpu.memory_space<vmem>>, vector<1x64xf32>
    %40 = vector.broadcast %39 : vector<1x64xf32> to vector<56x64xf32>
    %41 = arith.addf %38, %40 : vector<56x64xf32>
    %cst_12 = arith.constant 0.000000e+00 : f32
    %42 = vector.broadcast %cst_12 : f32 to vector<56x64xf32>
    %43 = arith.maximumf %41, %42 : vector<56x64xf32>
    %44 = arith.truncf %43 : vector<56x64xf32> to vector<56x64xbf16>
    %c0_13 = arith.constant 0 : index
    %c0_14 = arith.constant 0 : index
    %45 = vector.load %arg6[%c0_13, %c0_14] : memref<64x32xbf16, #tpu.memory_space<vmem>>, vector<64x32xbf16>
    %cst_15 = arith.constant dense<0.000000e+00> : vector<56x32xf32>
    %46 = tpu.matmul %44, %45, %cst_15 {dimension_numbers = #tpu.dot_dimension_numbers<[1], [0], [0], [1], [0, 0, 1, 1], [], []>} : vector<56x64xbf16>, vector<64x32xbf16>, vector<56x32xf32> -> vector<56x32xf32>
    %c0_16 = arith.constant 0 : index
    %c0_17 = arith.constant 0 : index
    %47 = vector.load %arg7[%c0_16, %c0_17] : memref<1x32xf32, #tpu.memory_space<vmem>>, vector<1x32xf32>
    %48 = vector.broadcast %47 : vector<1x32xf32> to vector<56x32xf32>
    %49 = arith.addf %46, %48 : vector<56x32xf32>
    %cst_18 = arith.constant 0.000000e+00 : f32
    %50 = vector.broadcast %cst_18 : f32 to vector<56x32xf32>
    %51 = arith.maximumf %49, %50 : vector<56x32xf32>
    %c0_19 = arith.constant 0 : index
    %c0_20 = arith.constant 0 : index
    %52 = vector.load %arg8[%c0_19, %c0_20] : memref<8x32xf32, #tpu.memory_space<vmem>>, vector<8x32xf32>
    %cst_21 = arith.constant dense<0.000000e+00> : vector<8x56xf32>
    %53 = tpu.matmul %52, %35, %cst_21 {dimension_numbers = #tpu.dot_dimension_numbers<[1], [1], [0], [0], [0, 0, 1, 0], [], []>} : vector<8x32xf32>, vector<56x32xf32>, vector<8x56xf32> -> vector<8x56xf32>
    %c0_22 = arith.constant 0 : index
    %c0_23 = arith.constant 0 : index
    %54 = vector.load %arg9[%c0_22, %c0_23] : memref<8x32xf32, #tpu.memory_space<vmem>>, vector<8x32xf32>
    %cst_24 = arith.constant dense<0.000000e+00> : vector<8x56xf32>
    %55 = tpu.matmul %54, %51, %cst_24 {dimension_numbers = #tpu.dot_dimension_numbers<[1], [1], [0], [0], [0, 0, 1, 0], [], []>} : vector<8x32xf32>, vector<56x32xf32>, vector<8x56xf32> -> vector<8x56xf32>
    %56 = arith.addf %53, %55 : vector<8x56xf32>
    %57 = vector.extract_strided_slice %56 {offsets = [0, 0], sizes = [1, 56], strides = [1, 1]} : vector<8x56xf32> to vector<1x56xf32>
    %c0_25 = arith.constant 0 : index
    %c0_26 = arith.constant 0 : index
    %58 = vector.load %arg10[%c0_25, %c0_26] : memref<1x1xf32, #tpu.memory_space<vmem>>, vector<1x1xf32>
    %59 = vector.broadcast %58 : vector<1x1xf32> to vector<1x56xf32>
    %60 = arith.addf %57, %59 : vector<1x56xf32>
    %61 = vector.shape_cast %60 : vector<1x56xf32> to vector<1x1x56xf32>
    %c0_27 = arith.constant 0 : index
    %c0_28 = arith.constant 0 : index
    %c0_29 = arith.constant 0 : index
    %62 = vector.load %arg11[%c0_27, %c0_28, %c0_29] : memref<1x1x56xf32, #tpu.memory_space<vmem>>, vector<1x1x56xf32>
    tpu.vector_store %arg11[%c0_27, %c0_28, %c0_29], %61 {strides = array<i32>} : memref<1x1x56xf32, #tpu.memory_space<vmem>>, vector<1x1x56xf32>,
    return
  }
  func.func @transform_0(%arg0: i32) -> (i32, i32) {
    %c0_i32 = arith.constant 0 : i32
    %c0_i32_0 = arith.constant 0 : i32
    return %arg0, %c0_i32 : i32, i32
  }
  func.func @transform_1(%arg0: i32) -> (i32, i32) {
    %c0_i32 = arith.constant 0 : i32
    %c0_i32_0 = arith.constant 0 : i32
    %c0_i32_1 = arith.constant 0 : i32
    return %c0_i32, %c0_i32_0 : i32, i32
  }
  func.func @transform_2(%arg0: i32) -> (i32, i32) {
    %c0_i32 = arith.constant 0 : i32
    %c0_i32_0 = arith.constant 0 : i32
    %c0_i32_1 = arith.constant 0 : i32
    return %c0_i32, %c0_i32_0 : i32, i32
  }
  func.func @transform_3(%arg0: i32) -> (i32, i32) {
    %c0_i32 = arith.constant 0 : i32
    %c0_i32_0 = arith.constant 0 : i32
    %c0_i32_1 = arith.constant 0 : i32
    return %c0_i32, %c0_i32_0 : i32, i32
  }
  func.func @transform_4(%arg0: i32) -> (i32, i32) {
    %c0_i32 = arith.constant 0 : i32
    %c0_i32_0 = arith.constant 0 : i32
    %c0_i32_1 = arith.constant 0 : i32
    return %c0_i32, %c0_i32_0 : i32, i32
  }
  func.func @transform_5(%arg0: i32) -> (i32, i32) {
    %c0_i32 = arith.constant 0 : i32
    %c0_i32_0 = arith.constant 0 : i32
    %c0_i32_1 = arith.constant 0 : i32
    return %c0_i32, %c0_i32_0 : i32, i32
  }
  func.func @transform_6(%arg0: i32) -> (i32, i32) {
    %c0_i32 = arith.constant 0 : i32
    %c0_i32_0 = arith.constant 0 : i32
    %c0_i32_1 = arith.constant 0 : i32
    return %c0_i32, %c0_i32_0 : i32, i32
  }
  func.func @transform_7(%arg0: i32) -> (i32, i32) {
    %c0_i32 = arith.constant 0 : i32
    %c0_i32_0 = arith.constant 0 : i32
    %c0_i32_1 = arith.constant 0 : i32
    return %c0_i32, %c0_i32_0 : i32, i32
  }
  func.func @transform_8(%arg0: i32) -> (i32, i32) {
    %c0_i32 = arith.constant 0 : i32
    %c0_i32_0 = arith.constant 0 : i32
    %c0_i32_1 = arith.constant 0 : i32
    return %c0_i32, %c0_i32_0 : i32, i32
  }
  func.func @transform_9(%arg0: i32) -> (i32, i32) {
    %c0_i32 = arith.constant 0 : i32
    %c0_i32_0 = arith.constant 0 : i32
    %c0_i32_1 = arith.constant 0 : i32
    return %c0_i32, %c0_i32_0 : i32, i32
  }
  func.func @transform_10(%arg0: i32) -> (i32, i32, i32) {
    %c0_i32 = arith.constant 0 : i32
    %c0_i32_0 = arith.constant 0 : i32
    %c0_i32_1 = arith.constant 0 : i32
    return %arg0, %c0_i32, %c0_i32_0 : i32, i32, i32
  }
}

</mosaic_0001>

<bundles_post_ra>
// kernel: tpu_custom_call.1
= control target key start
LH: loop header
LB: loop body
LE: loop exit
PB: predicated region body
PF: predicated region fallthrough
CT: control target
= control target key end

     0   :  { %s1677_s0 = inlined_call_operand.vmem [shape: f32[112,32], index: 0, kind: input, shape index: {}]   ;;  %s1678_s1 = inlined_call_operand.vmem [shape: f32[3,32], index: 1, kind: input, shape index: {}]   ;;  %s1679_s2 = inlined_call_operand.vmem [shape: f32[3,32], index: 2, kind: input, shape index: {}]   ;;  %s1680_s3 = inlined_call_operand.vmem [shape: bf16[32,64], index: 3, kind: input, shape index: {}]   ;;  %s1681_s4 = inlined_call_operand.vmem [shape: f32[1,64], index: 4, kind: input, shape index: {}]   ;;  %s1682_s5 = inlined_call_operand.vmem [shape: bf16[64,32], index: 5, kind: input, shape index: {}]   ;;  %s1683_s6 = inlined_call_operand.vmem [shape: f32[1,32], index: 6, kind: input, shape index: {}]   ;;  %s1684_s7 = inlined_call_operand.vmem [shape: f32[8,32], index: 7, kind: input, shape index: {}]   ;;  %s1685_s8 = inlined_call_operand.vmem [shape: f32[8,32], index: 8, kind: input, shape index: {}]   ;;  %s1686_s9 = inlined_call_operand.<no memory space> [shape: f32[1,1], index: 9, kind: input, shape index: {}]   ;;  %s1687_s10 = inlined_call_operand.hbm [shape: f32[2,1,56], index: 10, kind: output, shape index: {}]  }
   0x1   :  { %v15_v0 = vstv %s1686_s9 }
   0x2   :  { %16 = vst [vmem:[#allocation2] sm:$0x1] %v15_v0 }
   0x3   :  { %17 = vsyncpa [#allocation4], 0 }
   0x4   :  { %19 = vsyncpa [#allocation4 + $0x1], 0  ;;  %s1357_s15 = smov 0   ;;  %s1359_s16 = smov 0  }
   0x5   :  { %s1361_s17 = smov 0   ;;  %s1363_s18 = smov 0  }
   0x6 LB: > { %s1378_s9 = sadd.s32 4294967295, %s1293_s18   ;;  %s1051_s19 = sadd.s32 4294967294, %s1293_s18   ;;  %s1293_s18 = sphi %s1363_s18, %s1693_s18   ;;  %s1289_s17 = sphi %s1361_s17, %s1692_s17   ;;  %s1285_s16 = sphi %s1359_s16, %s1691_s16   ;;  %s1281_s15 = sphi %s1357_s15, %s1690_s15  }
   0x7   : > { %s1382_s20 = sadd.s32 1, %s1293_s18   ;;  %s247_s21 = sadd.s32 1, %s1289_s17 }
   0x8   : > { %s244_s22 = ssub.s32 %s1293_s18, %s1382_s20  ;;  %p257_p0 = scmp.ne.s32.totalorder %s1289_s17, %s1285_s16 }
   0x9   : > { %p245_p1 = scmp.eq.s32.totalorder %s244_s22, 0  ;;  %p258_p2 = scmp.eq.s32.totalorder %s1378_s9, 1 }
   0xa   : > { %p263_p3 = scmp.ne.s32.totalorder %s1285_s16, %s1281_s15  ;;  %p264_p4 = scmp.eq.s32.totalorder %s1051_s19, 1 }
   0xb   : > { %s1393_s23 = scalar_select %p245_p1, %s1289_s17, %s247_s21  }
   0xc   : > { %p1395_p5 = por %p258_p2, %p257_p0  ;;  %p1399_p6 = por %p264_p4, %p263_p3 }
   0xd   : > { %p1054_p7 = scmp.ge.s32.totalorder %s1293_s18, 1  ;;  %p318_p8 = scmp.lt.s32.totalorder %s1293_s18, 3 }
   0xf   : > { %p319_p9 = pnand %p1054_p7, %p318_p8 }
  0x10   : > { %s355_s28 = smul.u32 (!%p319_p9), 7, %s1378_s9  ;;  %s353_s11 = sand.u32 (!%p319_p9), 1, %s1285_s16  }
  0x11   : > { %322 = sbr.rel (%p319_p9) target bundleno = 709 (0x2c5), region = 60  ;;  %s1088_s12 = sshll.u32 (!%p319_p9), %s1378_s9, 4 }
  0x12   : > { %p356_p10 = scmp.lt.s32.totalorder (!%p319_p9), %s355_s28, 13  ;;  %s994_s22 = scalar_lea.hbm (!%p319_p9), %s1687_s10, %s1088_s12 }
  0x13   : > { %s984_s26 = scalar_lea.sflag (!%p319_p9), [#allocation4], %s353_s11 }
  0x16   : > { %v1227_v1 = vld [vmem:[%s1680_s3 + $0x8] sm:$0xff]   ;;  %v371_v2 = vlaneseq  ;;  %v1228_v3 = vld [vmem:[%s1680_s3] sm:$0xff]   ;;  %s1695_s28 = smov (!%p356_p10, %s355_s28), 13  ;;  %vm382_vm0 = vcmask 261120   ;;  %v1229_v33 = vld [vmem:[%s1682_s5 + $0x18] sm:$0xff]   ;;  %vm696_vm1 = vcmask 523264  }
  0x17   : > { %1121 = vmatprep.subr.bf16.mxu0 %v1227_v1  ;;  %v1415_v4 = vld [vmem:[%s1678_s1] sm:$0x7]  ;;  %s1055_s13 = sshll.u32 %s1695_s28, 3  ;;  %1133 = vmatprep.subr.bf16.mxu1 %v1229_v33  ;;  %v1230_v34 = vld [vmem:[%s1682_s5 + $0x10] sm:$0xff]   ;;  %v1231_v35 = vld [vmem:[%s1682_s5 + $0x8] sm:$0xff]   ;;  %vm1296_vm2 = vmmov 0  }
  0x18   : > { %v1417_v5 = vshrl.u32 %v371_v2, 7  ;;  %1122 = vmatpush3.bf16.msra.mxu0 %v1227_v1  ;;  %s359_s21 = scalar_lea.vmem %s1677_s0, %s1055_s13  ;;  %1134 = vmatpush3.bf16.msra.mxu1 %v1229_v33  ;;  %v1232_v36 = vld [vmem:[%s1682_s5] sm:$0xff]   ;;  %s354_s13 = scalar_lea.vmem [#allocation3], %s353_s11  ;;  %vm981_vm3 = vcmask 450560  }
  0x19   : > { %1123 = vmatprep.subr.bf16.mxu0 %v1228_v3  ;;  %v1427_v8 = vld [vmem:[%s359_s21] sm:$0xff]  ;;  %v1429_v9 = vld [vmem:[%s359_s21 + $0x8] sm:$0xff]  ;;  %v1431_v10 = vld [vmem:[%s359_s21 + $0x30] sm:$0xff]  ;;  %1135 = vmatprep.subr.bf16.mxu1 %v1230_v34  ;;  %s996_s14 = sshll.u32 %s354_s13, 4  ;;  %s1298_s28 = smov [#allocation3]   ;;  %s997_s14 = int_to_ptr.vmem [resolvable:$true] %s996_s14 }
  0x1a   : > { %v1420_v6 = vsub.s32 0, %v1417_v5  ;;  %v543_v11 = vpack.c.bf16 %v1429_v9, %v1427_v8  ;;  %v1436_v13 = vld [vmem:[%s359_s21 + $0x10] sm:$0xff]  ;;  %v1438_v14 = vld [vmem:[%s359_s21 + $0x18] sm:$0xff]  ;;  %v1440_v15 = vld [vmem:[%s359_s21 + $0x28] sm:$0xff]  ;;  %v546_v28 = vpack.c.bf16 %v1431_v10, %v1431_v10  ;;  %v431_v39 = vsub.s32 1, %v1417_v5  ;;  %s1233_s27 = scalar_lea.vmem %s997_s14, 16 }
  0x1b   : > { %v544_v16 = vpack.c.bf16 %v1438_v14, %v1436_v13  ;;  %v1445_v18 = vld [vmem:[%s359_s21 + $0x20] sm:$0xff]  ;;  %p1234_p11 = scmp.ne.s32.totalorder %s997_s14, %s1233_s27  ;;  %s1237_s9 = sshll.u32 %s1298_s28, 4  ;;  %s1238_s9 = int_to_ptr.vmem [resolvable:$false] %s1237_s9 }
  0x1c   : > { %v374_v7 = vrot.slane %v1415_v4, %v1420_v6  ;;  %1124 = vmatpush3.bf16.msra.mxu0 %v1228_v3  ;;  %1125 = vmatprep.mubr.msk.bf16.mxu0 %vm382_vm0, %v543_v11  ;;  %v545_v21 = vpack.c.bf16 %v1440_v15, %v1445_v18  ;;  %v1482_v37 = vld [vmem:[%s1679_s2] sm:$0x7]  ;;  %v432_v45 = vrot.slane %v1415_v4, %v431_v39  ;;  %s1239_s29 = scalar_lea.vmem %s1238_s9, 32  ;;  %p1240_p0 = scmp.lt.s32.totalorder %s997_s14, %s1238_s9 }
  0x1d   : > { %1136 = vmatpush3.bf16.msra.mxu1 %v1230_v34  ;;  %v414_v38 = vrot.slane %v1482_v37, %v1420_v6  ;;  %p1235_p12 = pnand %p1234_p11, %p1395_p5  ;;  %p1241_p1 = scmp.lt.s32.totalorder %s1239_s29, %s1233_s27 }
  0x1e   : > { %v381_v12 = vmul.f32 %v374_v7, %v1431_v10  ;;  %v380_v17 = vmul.f32 %v374_v7, %v1440_v15  ;;  %v379_v20 = vmul.f32 %v374_v7, %v1445_v18  ;;  %v378_v22 = vmul.f32 %v374_v7, %v1438_v14  ;;  %1137 = vmatprep.subr.bf16.mxu1 %v1231_v35 }
  0x1f   : > { %1126 = vmatmul.mubr.msk.bf16.vlgmr.msra.gmra.mxu0 %vm382_vm0, %v544_v16  ;;  %v377_v25 = vmul.f32 %v374_v7, %v1436_v13  ;;  %v376_v27 = vmul.f32 %v374_v7, %v1429_v9  ;;  %v375_v30 = vmul.f32 %v374_v7, %v1427_v8  ;;  %p1236_p13 = pneg %p1235_p12  ;;  %p1242_p2 = por %p1241_p1, %p1240_p0 }
  0x20   : > { %v401_v19 = vsel %vm382_vm0, %v381_v12, 0.0  ;;  %v398_v23 = vsel %vm382_vm0, %v380_v17, 0.0  ;;  %v395_v24 = vsel %vm382_vm0, %v379_v20, 0.0  ;;  %1129 = vmatprep.mubr.msk.bf16.mxu0 %vm382_vm0, %v545_v21  ;;  %v392_v26 = vsel %vm382_vm0, %v378_v22, 0.0 }
  0x21   : > { %402 = vadd.xlane.f32.xlu0 %v401_v19  ;;  %396 = vadd.xlane.f32.xlu1 %v395_v24  ;;  %v389_v29 = vsel %vm382_vm0, %v377_v25, 0.0  ;;  %v386_v31 = vsel %vm382_vm0, %v376_v27, 0.0  ;;  %v383_v32 = vsel %vm382_vm0, %v375_v30, 0.0  ;;  %p1243_p3 = pnand %p1242_p2, %p1236_p13 }
  0x22   : > { %1138 = vmatpush3.bf16.msra.mxu1 %v1231_v35 }
  0x23   : > { %1139 = vmatprep.subr.bf16.mxu1 %v1232_v36 }
  0x25   : > { %399 = vadd.xlane.f32.xlu0 %v398_v23  ;;  %393 = vadd.xlane.f32.xlu1 %v392_v26 }
  0x26   : > { %1140 = vmatpush3.bf16.msra.mxu1 %v1232_v36 }
  0x27   : > { %1130 = vmatmul.mubr.msk.bf16.gmra.mxu0 %vm382_vm0, %v546_v28 }
  0x29   : > { %390 = vadd.xlane.f32.xlu0 %v389_v29  ;;  %387 = vadd.xlane.f32.xlu1 %v386_v31  ;;  %v1056_v29 = vld [vmem:[%s1681_s4] ss:$0 sm:$0xff] }
  0x2d   : > { %384 = vadd.xlane.f32.xlu0 %v383_v32 }
  0xaa   : > { %v403_v40 = vpop.xlane.xlu0 %402  ;;  %v397_v42 = vpop.xlane.xlu1 %396 }
  0xab   : > { %v410_v41 = vmul.f32 %v403_v40, %v1431_v10  ;;  %v408_v44 = vmul.f32 %v397_v42, %v1445_v18 }
  0xad   : > { %v421_v43 = vadd.f32 %v414_v38, %v410_v41  ;;  %v419_v48 = vadd.f32 %v414_v38, %v408_v44 }
  0xae   : > { %v400_v46 = vpop.xlane.xlu0 %399  ;;  %v394_v50 = vpop.xlane.xlu1 %393 }
  0xaf   : > { %v409_v47 = vmul.f32 %v400_v46, %v1440_v15  ;;  %v1494_v49 = vadd.f32 %v421_v43, %v1431_v10  ;;  %v407_v52 = vmul.f32 %v394_v50, %v1438_v14  ;;  %v1499_v54 = vadd.f32 %v419_v48, %v1445_v18 }
  0xb1   : > { %v420_v51 = vadd.f32 %v414_v38, %v409_v47  ;;  %v439_v53 = vmul.f32 %v432_v45, %v1494_v49  ;;  %v418_v56 = vadd.f32 %v414_v38, %v407_v52  ;;  %v437_v59 = vmul.f32 %v432_v45, %v1499_v54 }
  0xb2   : > { %v391_v55 = vpop.xlane.xlu0 %390  ;;  %v388_v60 = vpop.xlane.xlu1 %387 }
  0xb3   : > { %v406_v57 = vmul.f32 %v391_v55, %v1436_v13  ;;  %v458_v58 = vsel %vm382_vm0, %v439_v53, 0.0  ;;  %v1505_v61 = vadd.f32 %v420_v51, %v1440_v15  ;;  %v405_v63 = vmul.f32 %v388_v60, %v1429_v9 }
  0xb4   : > { %459 = vadd.xlane.f32.xlu1 %v458_v58  ;;  %v452_v0 = vsel %vm382_vm0, %v437_v59, 0.0  ;;  %v1510_v1 = vadd.f32 %v418_v56, %v1438_v14  ;;  %v471_v60 = vrot.slane %v1482_v37, %v431_v39 }
  0xb5   : > { %v417_v62 = vadd.f32 %v414_v38, %v406_v57  ;;  %v438_v3 = vmul.f32 %v432_v45, %v1505_v61  ;;  %v416_v7 = vadd.f32 %v414_v38, %v405_v63 }
  0xb6   : > { %v385_v2 = vpop.xlane.xlu0 %384  ;;  %v436_v16 = vmul.f32 %v432_v45, %v1510_v1 }
  0xb7   : > { %v404_v11 = vmul.f32 %v385_v2, %v1427_v8  ;;  %v1515_v12 = vadd.f32 %v417_v62, %v1436_v13  ;;  %v455_v17 = vsel %vm382_vm0, %v438_v3, 0.0  ;;  %v1521_v21 = vadd.f32 %v416_v7, %v1429_v9 }
  0xb8   : > { %453 = vadd.xlane.f32.xlu1 %v452_v0  ;;  %456 = vadd.xlane.f32.xlu0 %v455_v17  ;;  %v449_v22 = vsel %vm382_vm0, %v436_v16, 0.0  ;;  %v488_v62 = vsub.s32 2, %v1417_v5  ;;  %v1295_v2 = vmov 0.0  }
  0xb9   : > { %v415_v19 = vadd.f32 %v414_v38, %v404_v11  ;;  %v435_v20 = vmul.f32 %v432_v45, %v1515_v12  ;;  %v434_v24 = vmul.f32 %v432_v45, %v1521_v21  ;;  %1149 = vmatprep.subr.mxu0 %v1295_v2  ;;  %1166 = vmatprep.subr.mxu1 %v1295_v2 }
  0xba   : > { %v489_v7 = vrot.slane %v1415_v4, %v488_v62  ;;  %1163 = vmatprep.mubr.msk.f32.mxu0 %vm1296_vm2, %v1295_v2 }
  0xbb   : > { %v446_v23 = vsel %vm382_vm0, %v435_v20, 0.0  ;;  %v1527_v25 = vadd.f32 %v415_v19, %v1427_v8  ;;  %v443_v27 = vsel %vm382_vm0, %v434_v24, 0.0 }
  0xbc   : > { %447 = vadd.xlane.f32.xlu1 %v446_v23  ;;  %450 = vadd.xlane.f32.xlu0 %v449_v22 }
  0xbd   : > { %v433_v26 = vmul.f32 %v432_v45, %v1527_v25 }
  0xbf   : > { %v440_v28 = vsel %vm382_vm0, %v433_v26, 0.0 }
  0xc0   : > { %441 = vadd.xlane.f32.xlu1 %v440_v28  ;;  %444 = vadd.xlane.f32.xlu0 %v443_v27 }
  0xdf   : > { %v1127_v30 = vpop.f32.mrf.mxu0 }
  0xe0   : > { %v625_v31 = vadd.f32 %v1127_v30, %v1056_v29 }
  0xe1   : > { %v616_v32 = vpop.f32.mrf.mxu0 }
  0xe2   : > { %v617_v33 = vadd.f32 %v1056_v29, %v616_v32  ;;  %v648_v36 = vmax.f32 %v625_v31, 0.0 }
  0xe3   : > { %v1128_v34 = vpop.f32.mrf.mxu0 }
  0xe4   : > { %v628_v35 = vadd.f32 %v1128_v34, %v1056_v29  ;;  %v646_v40 = vmax.f32 %v617_v33, 0.0 }
  0xe5   : > { %v619_v38 = vpop.f32.mrf.mxu0 }
  0xe6   : > { %v649_v41 = vmax.f32 %v628_v35, 0.0  ;;  %v620_v42 = vadd.f32 %v1056_v29, %v619_v38 }
  0xe7   : > { %v1131_v43 = vpop.f32.mrf.mxu0 }
  0xe8   : > { %v647_v44 = vmax.f32 %v620_v42, 0.0  ;;  %v654_v45 = vpack.c.bf16 %v649_v41, %v648_v36  ;;  %v641_v46 = vadd.f32 %v1131_v43, %v1056_v29 }
  0xe9   : > { %v632_v47 = vpop.f32.mrf.mxu0 }
  0xea   : > { %v633_v48 = vadd.f32 %v1056_v29, %v632_v47  ;;  %v653_v50 = vpack.c.bf16 %v647_v44, %v646_v40  ;;  %v652_v52 = vmax.f32 %v641_v46, 0.0 }
  0xeb   : > { %v1132_v51 = vpop.f32.mrf.mxu0 }
  0xec   : > { %1141 = vmatprep.mubr.msk.bf16.mxu1 %vm696_vm1, %v653_v50  ;;  %v650_v55 = vmax.f32 %v633_v48, 0.0  ;;  %v656_v58 = vpack.c.bf16 %v652_v52, %v652_v52 }
  0xed   : > { %v635_v53 = vpop.f32.mrf.mxu0  ;;  %1142 = vmatmul.mubr.msk.bf16.vlgmr.msra.gmra.mxu1 %vm696_vm1, %v654_v45 }
  0xee   : > { %v636_v56 = vadd.f32 %v1056_v29, %v635_v53  ;;  %v1297_v53 = vmov 0  }
  0xef   : > { %1225 = vset.pattern.permute.xlu1 %v1297_v53  ;;  %1226 = vset.pattern.permute.xlu0 %v1297_v53 }
  0xf0   : > { %v651_v57 = vmax.f32 %v636_v56, 0.0 }
  0xf2   : > { %v655_v59 = vpack.c.bf16 %v651_v57, %v650_v55  ;;  %v1063_v57 = vld [vmem:[%s1683_s6] ss:$0 sm:$0xff] }
  0xf4   : > { %1145 = vmatprep.mubr.msk.bf16.mxu1 %vm696_vm1, %v655_v59 }
  0xf5   : > { %1146 = vmatmul.mubr.msk.bf16.gmra.mxu1 %vm696_vm1, %v656_v58 }
  0xf6   : > { %1180 = vmatprep.mubr.msk.f32.mxu1 %vm1296_vm2, %v1295_v2 }
 0x13d   : > { %v460_v63 = vpop.xlane.xlu1 %459 }
 0x13e   : > { %v467_v0 = vmul.f32 %v460_v63, %v1431_v10 }
 0x140   : > { %v478_v3 = vadd.f32 %v471_v60, %v467_v0 }
 0x141   : > { %v454_v11 = vpop.xlane.xlu1 %453  ;;  %v457_v17 = vpop.xlane.xlu0 %456 }
 0x142   : > { %v465_v16 = vmul.f32 %v454_v11, %v1445_v18  ;;  %v1547_v39 = vadd.f32 %v478_v3, %v1494_v49  ;;  %v466_v19 = vmul.f32 %v457_v17, %v1440_v15 }
 0x144   : > { %v476_v20 = vadd.f32 %v471_v60, %v465_v16  ;;  %v496_v22 = vmul.f32 %v489_v7, %v1547_v39  ;;  %v477_v23 = vadd.f32 %v471_v60, %v466_v19 }
 0x145   : > { %v448_v24 = vpop.xlane.xlu1 %447  ;;  %v451_v27 = vpop.xlane.xlu0 %450 }
 0x146   : > { %v463_v26 = vmul.f32 %v448_v24, %v1436_v13  ;;  %v515_v28 = vsel %vm382_vm0, %v496_v22, 0.0  ;;  %v1554_v4 = vadd.f32 %v476_v20, %v1499_v54  ;;  %v464_v29 = vmul.f32 %v451_v27, %v1438_v14 }
 0x147   : > { %516 = vadd.xlane.f32.xlu0 %v515_v28  ;;  %v1558_v49 = vadd.f32 %v477_v23, %v1505_v61  ;;  %v528_v27 = vrot.slane %v1482_v37, %v488_v62 }
 0x148   : > { %v474_v30 = vadd.f32 %v471_v60, %v463_v26  ;;  %v494_v31 = vmul.f32 %v489_v7, %v1554_v4  ;;  %v475_v32 = vadd.f32 %v471_v60, %v464_v29 }
 0x149   : > { %v442_v33 = vpop.xlane.xlu1 %441  ;;  %v495_v34 = vmul.f32 %v489_v7, %v1558_v49  ;;  %v445_v36 = vpop.xlane.xlu0 %444 }
 0x14a   : > { %v461_v35 = vmul.f32 %v442_v33, %v1427_v8  ;;  %v509_v38 = vsel %vm382_vm0, %v494_v31, 0.0  ;;  %v1565_v54 = vadd.f32 %v474_v30, %v1515_v12  ;;  %v462_v40 = vmul.f32 %v445_v36, %v1429_v9 }
 0x14b   : > { %510 = vadd.xlane.f32.xlu0 %v509_v38  ;;  %v512_v61 = vsel %vm382_vm0, %v495_v34, 0.0  ;;  %v1570_v41 = vadd.f32 %v475_v32, %v1510_v1 }
 0x14c   : > { %v472_v42 = vadd.f32 %v471_v60, %v461_v35  ;;  %513 = vadd.xlane.f32.xlu1 %v512_v61  ;;  %v492_v43 = vmul.f32 %v489_v7, %v1565_v54  ;;  %v473_v44 = vadd.f32 %v471_v60, %v462_v40 }
 0x14d   : > { %v493_v45 = vmul.f32 %v489_v7, %v1570_v41 }
 0x14e   : > { %v503_v46 = vsel %vm382_vm0, %v492_v43, 0.0  ;;  %v1576_v12 = vadd.f32 %v472_v42, %v1527_v25  ;;  %v1580_v48 = vadd.f32 %v473_v44, %v1521_v21  ;;  %v970_v25 = vld [vmem:[#allocation2] sm:$0x1] }
 0x14f   : > { %504 = vadd.xlane.f32.xlu0 %v503_v46  ;;  %v506_v47 = vsel %vm382_vm0, %v493_v45, 0.0 }
 0x150   : > { %507 = vadd.xlane.f32.xlu1 %v506_v47  ;;  %v490_v1 = vmul.f32 %v489_v7, %v1576_v12  ;;  %v491_v50 = vmul.f32 %v489_v7, %v1580_v48 }
 0x152   : > { %v497_v51 = vsel %vm382_vm0, %v490_v1, 0.0  ;;  %v500_v52 = vsel %vm382_vm0, %v491_v50, 0.0 }
 0x153   : > { %498 = vadd.xlane.f32.xlu0 %v497_v51 }
 0x154   : > { %501 = vadd.xlane.f32.xlu1 %v500_v52 }
 0x165   : > { %973 = vperm.xlu1 %1225, %v970_v25  }
 0x1ad   : > { %v1143_v21 = vpop.f32.mrf.mxu1 }
 0x1ae   : > { %v752_v22 = vadd.f32 %v1143_v21, %v1063_v57 }
 0x1af   : > { %v743_v55 = vpop.f32.mrf.mxu1 }
 0x1b0   : > { %v775_v24 = vmax.f32 %v752_v22, 0.0  ;;  %v744_v28 = vadd.f32 %v1063_v57, %v743_v55 }
 0x1b1   : > { %v1144_v56 = vpop.f32.mrf.mxu1 }
 0x1b2   : > { %v755_v20 = vadd.f32 %v1144_v56, %v1063_v57  ;;  %v773_v33 = vmax.f32 %v744_v28, 0.0 }
 0x1b3   : > { %v746_v58 = vpop.f32.mrf.mxu1 }
 0x1b4   : > { %v776_v23 = vmax.f32 %v755_v20, 0.0  ;;  %v747_v26 = vadd.f32 %v1063_v57, %v746_v58 }
 0x1b5   : > { %v1147_v59 = vpop.f32.mrf.mxu1 }
 0x1b6   : > { %v768_v60 = vadd.f32 %v1147_v59, %v1063_v57  ;;  %v774_v29 = vmax.f32 %v747_v26, 0.0 }
 0x1b7   : > { %v759_v63 = vpop.f32.mrf.mxu1 }
 0x1b8   : > { %v779_v0 = vmax.f32 %v768_v60, 0.0  ;;  %v760_v11 = vadd.f32 %v1063_v57, %v759_v63 }
 0x1b9   : > { %v1148_v3 = vpop.f32.mrf.mxu1 }
 0x1ba   : > { %1150 = vmatpush3.xpose.msk.msra.mxu0 %vm382_vm0, %v779_v0  ;;  %v777_v19 = vmax.f32 %v760_v11, 0.0 }
 0x1bb   : > { %v762_v7 = vpop.f32.mrf.mxu1  ;;  %1151 = vmatprep.subr.mxu0 %v1295_v2 }
 0x1bc   : > { %v763_v16 = vadd.f32 %v1063_v57, %v762_v7 }
 0x1be   : > { %v778_v17 = vmax.f32 %v763_v16, 0.0 }
 0x1c0   : > { %1152 = vmatpush3.xpose.msk.msra.mxu0 %vm382_vm0, %v778_v17 }
 0x1c1   : > { %1153 = vmatprep.subr.mxu0 %v1295_v2 }
 0x1c4   : > { %1154 = vmatpush3.xpose.msk.msra.mxu0 %vm382_vm0, %v777_v19 }
 0x1c5   : > { %1155 = vmatprep.subr.mxu0 %v1295_v2 }
 0x1c8   : > { %1156 = vmatpush3.xpose.msk.msra.mxu0 %vm382_vm0, %v776_v23 }
 0x1c9   : > { %1157 = vmatprep.subr.mxu0 %v1295_v2 }
 0x1cc   : > { %1158 = vmatpush3.xpose.msk.msra.mxu0 %vm382_vm0, %v775_v24 }
 0x1cd   : > { %1159 = vmatprep.subr.mxu0 %v1295_v2 }
 0x1d0   : > { %v517_v30 = vpop.xlane.xlu0 %516  ;;  %1160 = vmatpush3.xpose.msk.msra.mxu0 %vm382_vm0, %v774_v29 }
 0x1d1   : > { %v524_v31 = vmul.f32 %v517_v30, %v1431_v10  ;;  %1161 = vmatprep.subr.mxu0 %v1295_v2  ;;  %v781_v10 = vld [vmem:[%s1685_s8] sm:$0xff] }
 0x1d3   : > { %v535_v32 = vadd.f32 %v528_v27, %v524_v31 }
 0x1d4   : > { %v511_v34 = vpop.xlane.xlu0 %510  ;;  %1162 = vmatpush3.xpose.msk.msra.mxu0 %vm382_vm0, %v773_v33 }
 0x1d5   : > { %v542_v35 = vadd.f32 %v535_v32, %v1547_v39  ;;  %v514_v36 = vpop.xlane.xlu1 %513  ;;  %v522_v37 = vmul.f32 %v511_v34, %v1445_v18 }
 0x1d6   : > { %v523_v5 = vmul.f32 %v514_v36, %v1440_v15 }
 0x1d7   : > { %1167 = vmatpush3.xpose.msk.msra.mxu1 %vm382_vm0, %v542_v35  ;;  %1164 = vmatmul.mubr.msk.f32.vlgmr.msra.gmra.mxu0 %vm382_vm0, %v781_v10  ;;  %v533_v40 = vadd.f32 %v528_v27, %v522_v37 }
 0x1d8   : > { %v534_v62 = vadd.f32 %v528_v27, %v523_v5  ;;  %1168 = vmatprep.subr.mxu1 %v1295_v2  ;;  %v505_v18 = vpop.xlane.xlu0 %504 }
 0x1d9   : > { %v508_v38 = vpop.xlane.xlu1 %507  ;;  %v540_v61 = vadd.f32 %v533_v40, %v1554_v4  ;;  %v520_v43 = vmul.f32 %v505_v18, %v1436_v13 }
 0x1da   : > { %v541_v39 = vadd.f32 %v534_v62, %v1558_v49  ;;  %v521_v15 = vmul.f32 %v508_v38, %v1438_v14 }
 0x1db   : > { %v531_v45 = vadd.f32 %v528_v27, %v520_v43 }
 0x1dc   : > { %1169 = vmatpush3.xpose.msk.msra.mxu1 %vm382_vm0, %v541_v39  ;;  %v532_v42 = vadd.f32 %v528_v27, %v521_v15  ;;  %v499_v46 = vpop.xlane.xlu0 %498 }
 0x1dd   : > { %1170 = vmatprep.subr.mxu1 %v1295_v2  ;;  %v502_v44 = vpop.xlane.xlu1 %501  ;;  %v538_v4 = vadd.f32 %v531_v45, %v1565_v54  ;;  %v518_v13 = vmul.f32 %v499_v46, %v1427_v8  ;;  %v780_v8 = vld [vmem:[%s1684_s7] sm:$0xff] }
 0x1de   : > { %v539_v49 = vadd.f32 %v532_v42, %v1570_v41  ;;  %v519_v14 = vmul.f32 %v502_v44, %v1429_v9 }
 0x1df   : > { %v529_v1 = vadd.f32 %v528_v27, %v518_v13 }
 0x1e0   : > { %1171 = vmatpush3.xpose.msk.msra.mxu1 %vm382_vm0, %v540_v61  ;;  %v530_v47 = vadd.f32 %v528_v27, %v519_v14 }
 0x1e1   : > { %1172 = vmatprep.subr.mxu1 %v1295_v2  ;;  %v536_v9 = vadd.f32 %v529_v1, %v1576_v12  ;;  %v974_v51 = vpop.permute.xlu1 %973 }
 0x1e2   : > { %v537_v41 = vadd.f32 %v530_v47, %v1580_v48  ;;  %v979_v48 = vrot.slane %v974_v51, %v1420_v6 }
 0x1e4   : > { %1173 = vmatpush3.xpose.msk.msra.mxu1 %vm382_vm0, %v539_v49 }
 0x1e5   : > { %1174 = vmatprep.subr.mxu1 %v1295_v2 }
 0x1e8   : > { %1175 = vmatpush3.xpose.msk.msra.mxu1 %vm382_vm0, %v538_v4 }
 0x1e9   : > { %1176 = vmatprep.subr.mxu1 %v1295_v2 }
 0x1ec   : > { %1177 = vmatpush3.xpose.msk.msra.mxu1 %vm382_vm0, %v537_v41 }
 0x1ed   : > { %1178 = vmatprep.subr.mxu1 %v1295_v2 }
 0x1f0   : > { %1179 = vmatpush3.xpose.msk.msra.mxu1 %vm382_vm0, %v536_v9 }
 0x1f3   : > { %1181 = vmatmul.mubr.msk.f32.vlgmr.msra.gmra.mxu1 %vm382_vm0, %v780_v8 }
 0x297   : > { %v872_v54 = vpop.f32.mrf.mxu0 }
 0x299   : > { %v1165_v50 = vpop.f32.mrf.mxu0 }
 0x2b3   : > { %v966_v52 = vpop.f32.mrf.mxu1 }
 0x2b4   : > { %v967_v2 = vadd.f32 %v966_v52, %v872_v54 }
 0x2b5   : > { %v1182_v12 = vpop.f32.mrf.mxu1 }
 0x2b6   : > { %v980_v25 = vadd.f32 %v979_v48, %v967_v2 }
 0x2b8   : > { %982 = vst.msk [vmem:[%s354_s13] sm:$0x1] %vm981_vm3, %v980_v25 }
 0x2b9   : > { %1246 = shalt.err (!%p1243_p3)
}
 0x2ba   : > { %s1247_s30 = scalar_lea.hbm %s994_s22, 16  ;;  %s1251_s13 = scalar_lea.hbm %s1687_s10, 32 }
 0x2bb   : > { %p1248_p4 = scmp.ne.s32.totalorder %s994_s22, %s1247_s30  ;;  %p1252_p9 = scmp.lt.s32.totalorder %s994_s22, %s1687_s10 }
 0x2bc   : > { %p1253_p10 = scmp.lt.s32.totalorder %s1251_s13, %s1247_s30 }
 0x2bd   : > { %p1249_p7 = pnand %p1248_p4, %p1395_p5 }
 0x2be   : > { %p1254_p11 = por %p1253_p10, %p1252_p9 }
 0x2bf   : > { %p1250_p8 = pneg %p1249_p7 }
 0x2c1   : > { %p1255_p12 = pnand %p1254_p11, %p1250_p8 }
 0x2c3   : > { %1258 = shalt.err (!%p1255_p12)
}
 0x2c4   : > { %1183 = dma.vmem_to_hbm [thread:$0]  (%p1395_p5), %s997_s14, 16, %s994_s22, %s984_s26  }
 0x2c5 PF: > { %p1189_p13 = scmp.ge.s32.totalorder %s1293_s18, 2  ;;  %s1008_s27 = sand.u32 1, %s1281_s15  }
 0x2c6   : > { %s1009_s28 = scalar_lea.sflag [#allocation4], %s1008_s27 }
 0x2c7   : > { %p1186_p0 = pnand %p1189_p13, %p1399_p6 }
 0x2c9   : > { %p1187_p1 = pneg %p1186_p0 }
 0x2cb   : > { %1276 = dma.done.wait (%p1187_p1), %s1009_s28, 16  }
 0x2cc   : > { %1278 = vsyncadd (%p1187_p1), %s1009_s28, 4294967280  ;;  %p22_p2 = scmp.ge.s32.totalorder %s1382_s20, 4   ;;  %s1690_s15 = smov %s1285_s16 }
 0x2cd   : > { %s1691_s16 = smov %s1289_s17  ;;  %s1692_s17 = smov %s1393_s23 }
 0x2ce   : > { %s1693_s18 = smov %s1382_s20  ;;  %24 = sbr.rel (!%p22_p2) target bundleno = 6 (0x6), region = 95 }
 0x2d3   :  { %1013 = vsyncpa [#allocation4], 1 }
 0x2d4   :  { %1015 = vsyncpa [#allocation4 + $0x1], 1 }

// kernel: tpu_custom_call.1
= control target key start
LH: loop header
LB: loop body
LE: loop exit
PB: predicated region body
PF: predicated region fallthrough
CT: control target
= control target key end

     0   :  { %s1677_s0 = inlined_call_operand.vmem [shape: f32[112,32], index: 0, kind: input, shape index: {}]   ;;  %s1678_s1 = inlined_call_operand.vmem [shape: f32[3,32], index: 1, kind: input, shape index: {}]   ;;  %s1679_s2 = inlined_call_operand.vmem [shape: f32[3,32], index: 2, kind: input, shape index: {}]   ;;  %s1680_s3 = inlined_call_operand.vmem [shape: bf16[32,64], index: 3, kind: input, shape index: {}]   ;;  %s1681_s4 = inlined_call_operand.vmem [shape: f32[1,64], index: 4, kind: input, shape index: {}]   ;;  %s1682_s5 = inlined_call_operand.vmem [shape: bf16[64,32], index: 5, kind: input, shape index: {}]   ;;  %s1683_s6 = inlined_call_operand.vmem [shape: f32[1,32], index: 6, kind: input, shape index: {}]   ;;  %s1684_s7 = inlined_call_operand.vmem [shape: f32[8,32], index: 7, kind: input, shape index: {}]   ;;  %s1685_s8 = inlined_call_operand.vmem [shape: f32[8,32], index: 8, kind: input, shape index: {}]   ;;  %s1686_s9 = inlined_call_operand.<no memory space> [shape: f32[1,1], index: 9, kind: input, shape index: {}]   ;;  %s1687_s10 = inlined_call_operand.hbm [shape: f32[2,1,56], index: 10, kind: output, shape index: {}]  }
   0x1   :  { %v15_v0 = vstv %s1686_s9 }
   0x2   :  { %16 = vst [vmem:[#allocation2] sm:$0x1] %v15_v0 }
   0x3   :  { %17 = vsyncpa [#allocation4], 0 }
   0x4   :  { %19 = vsyncpa [#allocation4 + $0x1], 0  ;;  %s1357_s15 = smov 0   ;;  %s1359_s16 = smov 0  }
   0x5   :  { %s1361_s17 = smov 0   ;;  %s1363_s18 = smov 0  }
   0x6 LB: > { %s1378_s9 = sadd.s32 4294967295, %s1293_s18   ;;  %s1051_s19 = sadd.s32 4294967294, %s1293_s18   ;;  %s1293_s18 = sphi %s1363_s18, %s1693_s18   ;;  %s1289_s17 = sphi %s1361_s17, %s1692_s17   ;;  %s1285_s16 = sphi %s1359_s16, %s1691_s16   ;;  %s1281_s15 = sphi %s1357_s15, %s1690_s15  }
   0x7   : > { %s1382_s20 = sadd.s32 1, %s1293_s18   ;;  %s247_s21 = sadd.s32 1, %s1289_s17 }
   0x8   : > { %s244_s22 = ssub.s32 %s1293_s18, %s1382_s20  ;;  %p257_p0 = scmp.ne.s32.totalorder %s1289_s17, %s1285_s16 }
   0x9   : > { %p245_p1 = scmp.eq.s32.totalorder %s244_s22, 0  ;;  %p258_p2 = scmp.eq.s32.totalorder %s1378_s9, 1 }
   0xa   : > { %p263_p3 = scmp.ne.s32.totalorder %s1285_s16, %s1281_s15  ;;  %p264_p4 = scmp.eq.s32.totalorder %s1051_s19, 1 }
   0xb   : > { %s1393_s23 = scalar_select %p245_p1, %s1289_s17, %s247_s21  }
   0xc   : > { %p1395_p5 = por %p258_p2, %p257_p0  ;;  %p1399_p6 = por %p264_p4, %p263_p3 }
   0xd   : > { %p1054_p7 = scmp.ge.s32.totalorder %s1293_s18, 1  ;;  %p318_p8 = scmp.lt.s32.totalorder %s1293_s18, 3 }
   0xf   : > { %p319_p9 = pnand %p1054_p7, %p318_p8 }
  0x10   : > { %s355_s28 = smul.u32 (!%p319_p9), 7, %s1378_s9  ;;  %s353_s11 = sand.u32 (!%p319_p9), 1, %s1285_s16  }
  0x11   : > { %322 = sbr.rel (%p319_p9) target bundleno = 709 (0x2c5), region = 60  ;;  %s1088_s12 = sshll.u32 (!%p319_p9), %s1378_s9, 4 }
  0x12   : > { %p356_p10 = scmp.lt.s32.totalorder (!%p319_p9), %s355_s28, 13  ;;  %s994_s22 = scalar_lea.hbm (!%p319_p9), %s1687_s10, %s1088_s12 }
  0x13   : > { %s984_s26 = scalar_lea.sflag (!%p319_p9), [#allocation4], %s353_s11 }
  0x16   : > { %v1227_v1 = vld [vmem:[%s1680_s3 + $0x8] sm:$0xff]   ;;  %v371_v2 = vlaneseq  ;;  %v1228_v3 = vld [vmem:[%s1680_s3] sm:$0xff]   ;;  %s1695_s28 = smov (!%p356_p10, %s355_s28), 13  ;;  %vm382_vm0 = vcmask 261120   ;;  %v1229_v33 = vld [vmem:[%s1682_s5 + $0x18] sm:$0xff]   ;;  %vm696_vm1 = vcmask 523264  }
  0x17   : > { %1121 = vmatprep.subr.bf16.mxu0 %v1227_v1  ;;  %v1415_v4 = vld [vmem:[%s1678_s1] sm:$0x7]  ;;  %s1055_s13 = sshll.u32 %s1695_s28, 3  ;;  %1133 = vmatprep.subr.bf16.mxu1 %v1229_v33  ;;  %v1230_v34 = vld [vmem:[%s1682_s5 + $0x10] sm:$0xff]   ;;  %v1231_v35 = vld [vmem:[%s1682_s5 + $0x8] sm:$0xff]   ;;  %vm1296_vm2 = vmmov 0  }
  0x18   : > { %v1417_v5 = vshrl.u32 %v371_v2, 7  ;;  %1122 = vmatpush3.bf16.msra.mxu0 %v1227_v1  ;;  %s359_s21 = scalar_lea.vmem %s1677_s0, %s1055_s13  ;;  %1134 = vmatpush3.bf16.msra.mxu1 %v1229_v33  ;;  %v1232_v36 = vld [vmem:[%s1682_s5] sm:$0xff]   ;;  %s354_s13 = scalar_lea.vmem [#allocation3], %s353_s11  ;;  %vm981_vm3 = vcmask 450560  }
  0x19   : > { %1123 = vmatprep.subr.bf16.mxu0 %v1228_v3  ;;  %v1427_v8 = vld [vmem:[%s359_s21] sm:$0xff]  ;;  %v1429_v9 = vld [vmem:[%s359_s21 + $0x8] sm:$0xff]  ;;  %v1431_v10 = vld [vmem:[%s359_s21 + $0x30] sm:$0xff]  ;;  %1135 = vmatprep.subr.bf16.mxu1 %v1230_v34  ;;  %s996_s14 = sshll.u32 %s354_s13, 4  ;;  %s1298_s28 = smov [#allocation3]   ;;  %s997_s14 = int_to_ptr.vmem [resolvable:$true] %s996_s14 }
  0x1a   : > { %v1420_v6 = vsub.s32 0, %v1417_v5  ;;  %v543_v11 = vpack.c.bf16 %v1429_v9, %v1427_v8  ;;  %v1436_v13 = vld [vmem:[%s359_s21 + $0x10] sm:$0xff]  ;;  %v1438_v14 = vld [vmem:[%s359_s21 + $0x18] sm:$0xff]  ;;  %v1440_v15 = vld [vmem:[%s359_s21 + $0x28] sm:$0xff]  ;;  %v546_v28 = vpack.c.bf16 %v1431_v10, %v1431_v10  ;;  %v431_v39 = vsub.s32 1, %v1417_v5  ;;  %s1233_s27 = scalar_lea.vmem %s997_s14, 16 }
  0x1b   : > { %v544_v16 = vpack.c.bf16 %v1438_v14, %v1436_v13  ;;  %v1445_v18 = vld [vmem:[%s359_s21 + $0x20] sm:$0xff]  ;;  %p1234_p11 = scmp.ne.s32.totalorder %s997_s14, %s1233_s27  ;;  %s1237_s9 = sshll.u32 %s1298_s28, 4  ;;  %s1238_s9 = int_to_ptr.vmem [resolvable:$false] %s1237_s9 }
  0x1c   : > { %v374_v7 = vrot.slane %v1415_v4, %v1420_v6  ;;  %1124 = vmatpush3.bf16.msra.mxu0 %v1228_v3  ;;  %1125 = vmatprep.mubr.msk.bf16.mxu0 %vm382_vm0, %v543_v11  ;;  %v545_v21 = vpack.c.bf16 %v1440_v15, %v1445_v18  ;;  %v1482_v37 = vld [vmem:[%s1679_s2] sm:$0x7]  ;;  %v432_v45 = vrot.slane %v1415_v4, %v431_v39  ;;  %s1239_s29 = scalar_lea.vmem %s1238_s9, 32  ;;  %p1240_p0 = scmp.lt.s32.totalorder %s997_s14, %s1238_s9 }
  0x1d   : > { %1136 = vmatpush3.bf16.msra.mxu1 %v1230_v34  ;;  %v414_v38 = vrot.slane %v1482_v37, %v1420_v6  ;;  %p1235_p12 = pnand %p1234_p11, %p1395_p5  ;;  %p1241_p1 = scmp.lt.s32.totalorder %s1239_s29, %s1233_s27 }
  0x1e   : > { %v381_v12 = vmul.f32 %v374_v7, %v1431_v10  ;;  %v380_v17 = vmul.f32 %v374_v7, %v1440_v15  ;;  %v379_v20 = vmul.f32 %v374_v7, %v1445_v18  ;;  %v378_v22 = vmul.f32 %v374_v7, %v1438_v14  ;;  %1137 = vmatprep.subr.bf16.mxu1 %v1231_v35 }
  0x1f   : > { %1126 = vmatmul.mubr.msk.bf16.vlgmr.msra.gmra.mxu0 %vm382_vm0, %v544_v16  ;;  %v377_v25 = vmul.f32 %v374_v7, %v1436_v13  ;;  %v376_v27 = vmul.f32 %v374_v7, %v1429_v9  ;;  %v375_v30 = vmul.f32 %v374_v7, %v1427_v8  ;;  %p1236_p13 = pneg %p1235_p12  ;;  %p1242_p2 = por %p1241_p1, %p1240_p0 }
  0x20   : > { %v401_v19 = vsel %vm382_vm0, %v381_v12, 0.0  ;;  %v398_v23 = vsel %vm382_vm0, %v380_v17, 0.0  ;;  %v395_v24 = vsel %vm382_vm0, %v379_v20, 0.0  ;;  %1129 = vmatprep.mubr.msk.bf16.mxu0 %vm382_vm0, %v545_v21  ;;  %v392_v26 = vsel %vm382_vm0, %v378_v22, 0.0 }
  0x21   : > { %402 = vadd.xlane.f32.xlu0 %v401_v19  ;;  %396 = vadd.xlane.f32.xlu1 %v395_v24  ;;  %v389_v29 = vsel %vm382_vm0, %v377_v25, 0.0  ;;  %v386_v31 = vsel %vm382_vm0, %v376_v27, 0.0  ;;  %v383_v32 = vsel %vm382_vm0, %v375_v30, 0.0  ;;  %p1243_p3 = pnand %p1242_p2, %p1236_p13 }
  0x22   : > { %1138 = vmatpush3.bf16.msra.mxu1 %v1231_v35 }
  0x23   : > { %1139 = vmatprep.subr.bf16.mxu1 %v1232_v36 }
  0x25   : > { %399 = vadd.xlane.f32.xlu0 %v398_v23  ;;  %393 = vadd.xlane.f32.xlu1 %v392_v26 }
  0x26   : > { %1140 = vmatpush3.bf16.msra.mxu1 %v1232_v36 }
  0x27   : > { %1130 = vmatmul.mubr.msk.bf16.gmra.mxu0 %vm382_vm0, %v546_v28 }
  0x29   : > { %390 = vadd.xlane.f32.xlu0 %v389_v29  ;;  %387 = vadd.xlane.f32.xlu1 %v386_v31  ;;  %v1056_v29 = vld [vmem:[%s1681_s4] ss:$0 sm:$0xff] }
  0x2d   : > { %384 = vadd.xlane.f32.xlu0 %v383_v32 }
  0xaa   : > { %v403_v40 = vpop.xlane.xlu0 %402  ;;  %v397_v42 = vpop.xlane.xlu1 %396 }
  0xab   : > { %v410_v41 = vmul.f32 %v403_v40, %v1431_v10  ;;  %v408_v44 = vmul.f32 %v397_v42, %v1445_v18 }
  0xad   : > { %v421_v43 = vadd.f32 %v414_v38, %v410_v41  ;;  %v419_v48 = vadd.f32 %v414_v38, %v408_v44 }
  0xae   : > { %v400_v46 = vpop.xlane.xlu0 %399  ;;  %v394_v50 = vpop.xlane.xlu1 %393 }
  0xaf   : > { %v409_v47 = vmul.f32 %v400_v46, %v1440_v15  ;;  %v1494_v49 = vadd.f32 %v421_v43, %v1431_v10  ;;  %v407_v52 = vmul.f32 %v394_v50, %v1438_v14  ;;  %v1499_v54 = vadd.f32 %v419_v48, %v1445_v18 }
  0xb1   : > { %v420_v51 = vadd.f32 %v414_v38, %v409_v47  ;;  %v439_v53 = vmul.f32 %v432_v45, %v1494_v49  ;;  %v418_v56 = vadd.f32 %v414_v38, %v407_v52  ;;  %v437_v59 = vmul.f32 %v432_v45, %v1499_v54 }
  0xb2   : > { %v391_v55 = vpop.xlane.xlu0 %390  ;;  %v388_v60 = vpop.xlane.xlu1 %387 }
  0xb3   : > { %v406_v57 = vmul.f32 %v391_v55, %v1436_v13  ;;  %v458_v58 = vsel %vm382_vm0, %v439_v53, 0.0  ;;  %v1505_v61 = vadd.f32 %v420_v51, %v1440_v15  ;;  %v405_v63 = vmul.f32 %v388_v60, %v1429_v9 }
  0xb4   : > { %459 = vadd.xlane.f32.xlu1 %v458_v58  ;;  %v452_v0 = vsel %vm382_vm0, %v437_v59, 0.0  ;;  %v1510_v1 = vadd.f32 %v418_v56, %v1438_v14  ;;  %v471_v60 = vrot.slane %v1482_v37, %v431_v39 }
  0xb5   : > { %v417_v62 = vadd.f32 %v414_v38, %v406_v57  ;;  %v438_v3 = vmul.f32 %v432_v45, %v1505_v61  ;;  %v416_v7 = vadd.f32 %v414_v38, %v405_v63 }
  0xb6   : > { %v385_v2 = vpop.xlane.xlu0 %384  ;;  %v436_v16 = vmul.f32 %v432_v45, %v1510_v1 }
  0xb7   : > { %v404_v11 = vmul.f32 %v385_v2, %v1427_v8  ;;  %v1515_v12 = vadd.f32 %v417_v62, %v1436_v13  ;;  %v455_v17 = vsel %vm382_vm0, %v438_v3, 0.0  ;;  %v1521_v21 = vadd.f32 %v416_v7, %v1429_v9 }
  0xb8   : > { %453 = vadd.xlane.f32.xlu1 %v452_v0  ;;  %456 = vadd.xlane.f32.xlu0 %v455_v17  ;;  %v449_v22 = vsel %vm382_vm0, %v436_v16, 0.0  ;;  %v488_v62 = vsub.s32 2, %v1417_v5  ;;  %v1295_v2 = vmov 0.0  }
  0xb9   : > { %v415_v19 = vadd.f32 %v414_v38, %v404_v11  ;;  %v435_v20 = vmul.f32 %v432_v45, %v1515_v12  ;;  %v434_v24 = vmul.f32 %v432_v45, %v1521_v21  ;;  %1149 = vmatprep.subr.mxu0 %v1295_v2  ;;  %1166 = vmatprep.subr.mxu1 %v1295_v2 }
  0xba   : > { %v489_v7 = vrot.slane %v1415_v4, %v488_v62  ;;  %1163 = vmatprep.mubr.msk.f32.mxu0 %vm1296_vm2, %v1295_v2 }
  0xbb   : > { %v446_v23 = vsel %vm382_vm0, %v435_v20, 0.0  ;;  %v1527_v25 = vadd.f32 %v415_v19, %v1427_v8  ;;  %v443_v27 = vsel %vm382_vm0, %v434_v24, 0.0 }
  0xbc   : > { %447 = vadd.xlane.f32.xlu1 %v446_v23  ;;  %450 = vadd.xlane.f32.xlu0 %v449_v22 }
  0xbd   : > { %v433_v26 = vmul.f32 %v432_v45, %v1527_v25 }
  0xbf   : > { %v440_v28 = vsel %vm382_vm0, %v433_v26, 0.0 }
  0xc0   : > { %441 = vadd.xlane.f32.xlu1 %v440_v28  ;;  %444 = vadd.xlane.f32.xlu0 %v443_v27 }
  0xdf   : > { %v1127_v30 = vpop.f32.mrf.mxu0 }
  0xe0   : > { %v625_v31 = vadd.f32 %v1127_v30, %v1056_v29 }
  0xe1   : > { %v616_v32 = vpop.f32.mrf.mxu0 }
  0xe2   : > { %v617_v33 = vadd.f32 %v1056_v29, %v616_v32  ;;  %v648_v36 = vmax.f32 %v625_v31, 0.0 }
  0xe3   : > { %v1128_v34 = vpop.f32.mrf.mxu0 }
  0xe4   : > { %v628_v35 = vadd.f32 %v1128_v34, %v1056_v29  ;;  %v646_v40 = vmax.f32 %v617_v33, 0.0 }
  0xe5   : > { %v619_v38 = vpop.f32.mrf.mxu0 }
  0xe6   : > { %v649_v41 = vmax.f32 %v628_v35, 0.0  ;;  %v620_v42 = vadd.f32 %v1056_v29, %v619_v38 }
  0xe7   : > { %v1131_v43 = vpop.f32.mrf.mxu0 }
  0xe8   : > { %v647_v44 = vmax.f32 %v620_v42, 0.0  ;;  %v654_v45 = vpack.c.bf16 %v649_v41, %v648_v36  ;;  %v641_v46 = vadd.f32 %v1131_v43, %v1056_v29 }
  0xe9   : > { %v632_v47 = vpop.f32.mrf.mxu0 }
  0xea   : > { %v633_v48 = vadd.f32 %v1056_v29, %v632_v47  ;;  %v653_v50 = vpack.c.bf16 %v647_v44, %v646_v40  ;;  %v652_v52 = vmax.f32 %v641_v46, 0.0 }
  0xeb   : > { %v1132_v51 = vpop.f32.mrf.mxu0 }
  0xec   : > { %1141 = vmatprep.mubr.msk.bf16.mxu1 %vm696_vm1, %v653_v50  ;;  %v650_v55 = vmax.f32 %v633_v48, 0.0  ;;  %v656_v58 = vpack.c.bf16 %v652_v52, %v652_v52 }
  0xed   : > { %v635_v53 = vpop.f32.mrf.mxu0  ;;  %1142 = vmatmul.mubr.msk.bf16.vlgmr.msra.gmra.mxu1 %vm696_vm1, %v654_v45 }
  0xee   : > { %v636_v56 = vadd.f32 %v1056_v29, %v635_v53  ;;  %v1297_v53 = vmov 0  }
  0xef   : > { %1225 = vset.pattern.permute.xlu1 %v1297_v53  ;;  %1226 = vset.pattern.permute.xlu0 %v1297_v53 }
  0xf0   : > { %v651_v57 = vmax.f32 %v636_v56, 0.0 }
  0xf2   : > { %v655_v59 = vpack.c.bf16 %v651_v57, %v650_v55  ;;  %v1063_v57 = vld [vmem:[%s1683_s6] ss:$0 sm:$0xff] }
  0xf4   : > { %1145 = vmatprep.mubr.msk.bf16.mxu1 %vm696_vm1, %v655_v59 }
  0xf5   : > { %1146 = vmatmul.mubr.msk.bf16.gmra.mxu1 %vm696_vm1, %v656_v58 }
  0xf6   : > { %1180 = vmatprep.mubr.msk.f32.mxu1 %vm1296_vm2, %v1295_v2 }
 0x13d   : > { %v460_v63 = vpop.xlane.xlu1 %459 }
 0x13e   : > { %v467_v0 = vmul.f32 %v460_v63, %v1431_v10 }
 0x140   : > { %v478_v3 = vadd.f32 %v471_v60, %v467_v0 }
 0x141   : > { %v454_v11 = vpop.xlane.xlu1 %453  ;;  %v457_v17 = vpop.xlane.xlu0 %456 }
 0x142   : > { %v465_v16 = vmul.f32 %v454_v11, %v1445_v18  ;;  %v1547_v39 = vadd.f32 %v478_v3, %v1494_v49  ;;  %v466_v19 = vmul.f32 %v457_v17, %v1440_v15 }
 0x144   : > { %v476_v20 = vadd.f32 %v471_v60, %v465_v16  ;;  %v496_v22 = vmul.f32 %v489_v7, %v1547_v39  ;;  %v477_v23 = vadd.f32 %v471_v60, %v466_v19 }
 0x145   : > { %v448_v24 = vpop.xlane.xlu1 %447  ;;  %v451_v27 = vpop.xlane.xlu0 %450 }
 0x146   : > { %v463_v26 = vmul.f32 %v448_v24, %v1436_v13  ;;  %v515_v28 = vsel %vm382_vm0, %v496_v22, 0.0  ;;  %v1554_v4 = vadd.f32 %v476_v20, %v1499_v54  ;;  %v464_v29 = vmul.f32 %v451_v27, %v1438_v14 }
 0x147   : > { %516 = vadd.xlane.f32.xlu0 %v515_v28  ;;  %v1558_v49 = vadd.f32 %v477_v23, %v1505_v61  ;;  %v528_v27 = vrot.slane %v1482_v37, %v488_v62 }
 0x148   : > { %v474_v30 = vadd.f32 %v471_v60, %v463_v26  ;;  %v494_v31 = vmul.f32 %v489_v7, %v1554_v4  ;;  %v475_v32 = vadd.f32 %v471_v60, %v464_v29 }
 0x149   : > { %v442_v33 = vpop.xlane.xlu1 %441  ;;  %v495_v34 = vmul.f32 %v489_v7, %v1558_v49  ;;  %v445_v36 = vpop.xlane.xlu0 %444 }
 0x14a   : > { %v461_v35 = vmul.f32 %v442_v33, %v1427_v8  ;;  %v509_v38 = vsel %vm382_vm0, %v494_v31, 0.0  ;;  %v1565_v54 = vadd.f32 %v474_v30, %v1515_v12  ;;  %v462_v40 = vmul.f32 %v445_v36, %v1429_v9 }
 0x14b   : > { %510 = vadd.xlane.f32.xlu0 %v509_v38  ;;  %v512_v61 = vsel %vm382_vm0, %v495_v34, 0.0  ;;  %v1570_v41 = vadd.f32 %v475_v32, %v1510_v1 }
 0x14c   : > { %v472_v42 = vadd.f32 %v471_v60, %v461_v35  ;;  %513 = vadd.xlane.f32.xlu1 %v512_v61  ;;  %v492_v43 = vmul.f32 %v489_v7, %v1565_v54  ;;  %v473_v44 = vadd.f32 %v471_v60, %v462_v40 }
 0x14d   : > { %v493_v45 = vmul.f32 %v489_v7, %v1570_v41 }
 0x14e   : > { %v503_v46 = vsel %vm382_vm0, %v492_v43, 0.0  ;;  %v1576_v12 = vadd.f32 %v472_v42, %v1527_v25  ;;  %v1580_v48 = vadd.f32 %v473_v44, %v1521_v21  ;;  %v970_v25 = vld [vmem:[#allocation2] sm:$0x1] }
 0x14f   : > { %504 = vadd.xlane.f32.xlu0 %v503_v46  ;;  %v506_v47 = vsel %vm382_vm0, %v493_v45, 0.0 }
 0x150   : > { %507 = vadd.xlane.f32.xlu1 %v506_v47  ;;  %v490_v1 = vmul.f32 %v489_v7, %v1576_v12  ;;  %v491_v50 = vmul.f32 %v489_v7, %v1580_v48 }
 0x152   : > { %v497_v51 = vsel %vm382_vm0, %v490_v1, 0.0  ;;  %v500_v52 = vsel %vm382_vm0, %v491_v50, 0.0 }
 0x153   : > { %498 = vadd.xlane.f32.xlu0 %v497_v51 }
 0x154   : > { %501 = vadd.xlane.f32.xlu1 %v500_v52 }
 0x165   : > { %973 = vperm.xlu1 %1225, %v970_v25  }
 0x1ad   : > { %v1143_v21 = vpop.f32.mrf.mxu1 }
 0x1ae   : > { %v752_v22 = vadd.f32 %v1143_v21, %v1063_v57 }
 0x1af   : > { %v743_v55 = vpop.f32.mrf.mxu1 }
 0x1b0   : > { %v775_v24 = vmax.f32 %v752_v22, 0.0  ;;  %v744_v28 = vadd.f32 %v1063_v57, %v743_v55 }
 0x1b1   : > { %v1144_v56 = vpop.f32.mrf.mxu1 }
 0x1b2   : > { %v755_v20 = vadd.f32 %v1144_v56, %v1063_v57  ;;  %v773_v33 = vmax.f32 %v744_v28, 0.0 }
 0x1b3   : > { %v746_v58 = vpop.f32.mrf.mxu1 }
 0x1b4   : > { %v776_v23 = vmax.f32 %v755_v20, 0.0  ;;  %v747_v26 = vadd.f32 %v1063_v57, %v746_v58 }
 0x1b5   : > { %v1147_v59 = vpop.f32.mrf.mxu1 }
 0x1b6   : > { %v768_v60 = vadd.f32 %v1147_v59, %v1063_v57  ;;  %v774_v29 = vmax.f32 %v747_v26, 0.0 }
 0x1b7   : > { %v759_v63 = vpop.f32.mrf.mxu1 }
 0x1b8   : > { %v779_v0 = vmax.f32 %v768_v60, 0.0  ;;  %v760_v11 = vadd.f32 %v1063_v57, %v759_v63 }
 0x1b9   : > { %v1148_v3 = vpop.f32.mrf.mxu1 }
 0x1ba   : > { %1150 = vmatpush3.xpose.msk.msra.mxu0 %vm382_vm0, %v779_v0  ;;  %v777_v19 = vmax.f32 %v760_v11, 0.0 }
 0x1bb   : > { %v762_v7 = vpop.f32.mrf.mxu1  ;;  %1151 = vmatprep.subr.mxu0 %v1295_v2 }
 0x1bc   : > { %v763_v16 = vadd.f32 %v1063_v57, %v762_v7 }
 0x1be   : > { %v778_v17 = vmax.f32 %v763_v16, 0.0 }
 0x1c0   : > { %1152 = vmatpush3.xpose.msk.msra.mxu0 %vm382_vm0, %v778_v17 }
 0x1c1   : > { %1153 = vmatprep.subr.mxu0 %v1295_v2 }
 0x1c4   : > { %1154 = vmatpush3.xpose.msk.msra.mxu0 %vm382_vm0, %v777_v19 }
 0x1c5   : > { %1155 = vmatprep.subr.mxu0 %v1295_v2 }
 0x1c8   : > { %1156 = vmatpush3.xpose.msk.msra.mxu0 %vm382_vm0, %v776_v23 }
 0x1c9   : > { %1157 = vmatprep.subr.mxu0 %v1295_v2 }
 0x1cc   : > { %1158 = vmatpush3.xpose.msk.msra.mxu0 %vm382_vm0, %v775_v24 }
 0x1cd   : > { %1159 = vmatprep.subr.mxu0 %v1295_v2 }
 0x1d0   : > { %v517_v30 = vpop.xlane.xlu0 %516  ;;  %1160 = vmatpush3.xpose.msk.msra.mxu0 %vm382_vm0, %v774_v29 }
 0x1d1   : > { %v524_v31 = vmul.f32 %v517_v30, %v1431_v10  ;;  %1161 = vmatprep.subr.mxu0 %v1295_v2  ;;  %v781_v10 = vld [vmem:[%s1685_s8] sm:$0xff] }
 0x1d3   : > { %v535_v32 = vadd.f32 %v528_v27, %v524_v31 }
 0x1d4   : > { %v511_v34 = vpop.xlane.xlu0 %510  ;;  %1162 = vmatpush3.xpose.msk.msra.mxu0 %vm382_vm0, %v773_v33 }
 0x1d5   : > { %v542_v35 = vadd.f32 %v535_v32, %v1547_v39  ;;  %v514_v36 = vpop.xlane.xlu1 %513  ;;  %v522_v37 = vmul.f32 %v511_v34, %v1445_v18 }
 0x1d6   : > { %v523_v5 = vmul.f32 %v514_v36, %v1440_v15 }
 0x1d7   : > { %1167 = vmatpush3.xpose.msk.msra.mxu1 %vm382_vm0, %v542_v35  ;;  %1164 = vmatmul.mubr.msk.f32.vlgmr.msra.gmra.mxu0 %vm382_vm0, %v781_v10  ;;  %v533_v40 = vadd.f32 %v528_v27, %v522_v37 }
 0x1d8   : > { %v534_v62 = vadd.f32 %v528_v27, %v523_v5  ;;  %1168 = vmatprep.subr.mxu1 %v1295_v2  ;;  %v505_v18 = vpop.xlane.xlu0 %504 }
 0x1d9   : > { %v508_v38 = vpop.xlane.xlu1 %507  ;;  %v540_v61 = vadd.f32 %v533_v40, %v1554_v4  ;;  %v520_v43 = vmul.f32 %v505_v18, %v1436_v13 }
 0x1da   : > { %v541_v39 = vadd.f32 %v534_v62, %v1558_v49  ;;  %v521_v15 = vmul.f32 %v508_v38, %v1438_v14 }
 0x1db   : > { %v531_v45 = vadd.f32 %v528_v27, %v520_v43 }
 0x1dc   : > { %1169 = vmatpush3.xpose.msk.msra.mxu1 %vm382_vm0, %v541_v39  ;;  %v532_v42 = vadd.f32 %v528_v27, %v521_v15  ;;  %v499_v46 = vpop.xlane.xlu0 %498 }
 0x1dd   : > { %1170 = vmatprep.subr.mxu1 %v1295_v2  ;;  %v502_v44 = vpop.xlane.xlu1 %501  ;;  %v538_v4 = vadd.f32 %v531_v45, %v1565_v54  ;;  %v518_v13 = vmul.f32 %v499_v46, %v1427_v8  ;;  %v780_v8 = vld [vmem:[%s1684_s7] sm:$0xff] }
 0x1de   : > { %v539_v49 = vadd.f32 %v532_v42, %v1570_v41  ;;  %v519_v14 = vmul.f32 %v502_v44, %v1429_v9 }
 0x1df   : > { %v529_v1 = vadd.f32 %v528_v27, %v518_v13 }
 0x1e0   : > { %1171 = vmatpush3.xpose.msk.msra.mxu1 %vm382_vm0, %v540_v61  ;;  %v530_v47 = vadd.f32 %v528_v27, %v519_v14 }
 0x1e1   : > { %1172 = vmatprep.subr.mxu1 %v1295_v2  ;;  %v536_v9 = vadd.f32 %v529_v1, %v1576_v12  ;;  %v974_v51 = vpop.permute.xlu1 %973 }
 0x1e2   : > { %v537_v41 = vadd.f32 %v530_v47, %v1580_v48  ;;  %v979_v48 = vrot.slane %v974_v51, %v1420_v6 }
 0x1e4   : > { %1173 = vmatpush3.xpose.msk.msra.mxu1 %vm382_vm0, %v539_v49 }
 0x1e5   : > { %1174 = vmatprep.subr.mxu1 %v1295_v2 }
 0x1e8   : > { %1175 = vmatpush3.xpose.msk.msra.mxu1 %vm382_vm0, %v538_v4 }
 0x1e9   : > { %1176 = vmatprep.subr.mxu1 %v1295_v2 }
 0x1ec   : > { %1177 = vmatpush3.xpose.msk.msra.mxu1 %vm382_vm0, %v537_v41 }
 0x1ed   : > { %1178 = vmatprep.subr.mxu1 %v1295_v2 }
 0x1f0   : > { %1179 = vmatpush3.xpose.msk.msra.mxu1 %vm382_vm0, %v536_v9 }
 0x1f3   : > { %1181 = vmatmul.mubr.msk.f32.vlgmr.msra.gmra.mxu1 %vm382_vm0, %v780_v8 }
 0x297   : > { %v872_v54 = vpop.f32.mrf.mxu0 }
 0x299   : > { %v1165_v50 = vpop.f32.mrf.mxu0 }
 0x2b3   : > { %v966_v52 = vpop.f32.mrf.mxu1 }
 0x2b4   : > { %v967_v2 = vadd.f32 %v966_v52, %v872_v54 }
 0x2b5   : > { %v1182_v12 = vpop.f32.mrf.mxu1 }
 0x2b6   : > { %v980_v25 = vadd.f32 %v979_v48, %v967_v2 }
 0x2b8   : > { %982 = vst.msk [vmem:[%s354_s13] sm:$0x1] %vm981_vm3, %v980_v25 }
 0x2b9   : > { %1246 = shalt.err (!%p1243_p3)
}
 0x2ba   : > { %s1247_s30 = scalar_lea.hbm %s994_s22, 16  ;;  %s1251_s13 = scalar_lea.hbm %s1687_s10, 32 }
 0x2bb   : > { %p1248_p4 = scmp.ne.s32.totalorder %s994_s22, %s1247_s30  ;;  %p1252_p9 = scmp.lt.s32.totalorder %s994_s22, %s1687_s10 }
 0x2bc   : > { %p1253_p10 = scmp.lt.s32.totalorder %s1251_s13, %s1247_s30 }
 0x2bd   : > { %p1249_p7 = pnand %p1248_p4, %p1395_p5 }
 0x2be   : > { %p1254_p11 = por %p1253_p10, %p1252_p9 }
 0x2bf   : > { %p1250_p8 = pneg %p1249_p7 }
 0x2c1   : > { %p1255_p12 = pnand %p1254_p11, %p1250_p8 }
 0x2c3   : > { %1258 = shalt.err (!%p1255_p12)
}
 0x2c4   : > { %1183 = dma.vmem_to_hbm [thread:$0]  (%p1395_p5), %s997_s14, 16, %s994_s22, %s984_s26  }
 0x2c5 PF: > { %p1189_p13 = scmp.ge.s32.totalorder %s1293_s18, 2  ;;  %s1008_s27 = sand.u32 1, %s1281_s15  }
 0x2c6   : > { %s1009_s28 = scalar_lea.sflag [#allocation4], %s1008_s27 }
 0x2c7   : > { %p1186_p0 = pnand %p1189_p13, %p1399_p6 }
 0x2c9   : > { %p1187_p1 = pneg %p1186_p0 }
 0x2cb   : > { %1276 = dma.done.wait (%p1187_p1), %s1009_s28, 16  }
 0x2cc   : > { %1278 = vsyncadd (%p1187_p1), %s1009_s28, 4294967280  ;;  %p22_p2 = scmp.ge.s32.totalorder %s1382_s20, 4   ;;  %s1690_s15 = smov %s1285_s16 }
 0x2cd   : > { %s1691_s16 = smov %s1289_s17  ;;  %s1692_s17 = smov %s1393_s23 }
 0x2ce   : > { %s1693_s18 = smov %s1382_s20  ;;  %24 = sbr.rel (!%p22_p2) target bundleno = 6 (0x6), region = 95 }
 0x2d3   :  { %1013 = vsyncpa [#allocation4], 1 }
 0x2d4   :  { %1015 = vsyncpa [#allocation4 + $0x1], 1 }

</bundles_post_ra>
